<compile_context>
chip_gen: v7x
topology: tpu7x:2x2x1
jax: 0.10.0
libtpu: 0.0.40
codegen_flags: <defaults>
</compile_context>

<pallas_src>
import functools

import jax
import jax.numpy as jnp
from jax.experimental import pallas as pl
from jax.experimental.pallas import tpu as pltpu

EPS = 1e-5
NEG_INF = -1e30


def _round_up(x, m):
    return ((x + m - 1) // m) * m


def additive_attn_kernel(q_ref, memflat_ref, logmask_ref, w_ref, b_ref, bv_ref,
                         out_ref, *, tanh_in_bf16):
    """One batch tile of AdditiveAttention.

    q_ref       : (TB, Q)     matmul dtype
    memflat_ref : (TB*S, M)   matmul dtype (batch*seq flattened in the wrapper)
    logmask_ref : (TB, S)     f32, precomputed log(mask) with NEG_INF guard
    w_ref       : (Q+M, A)    matmul dtype, packed [wq ; wu]
    b_ref       : (3, A)      f32, packed [bq ; bu ; wv]
    bv_ref      : (1, 1)      f32 scalar bias in SMEM
    out_ref     : (TB, P)     f32 lane-dense slab: [:, :M]=aggr, [:, M:M+S]=weights
    """
    TB, Q = q_ref.shape
    _, M = memflat_ref.shape
    S = logmask_ref.shape[1]
    P = out_ref.shape[1]
    A = w_ref.shape[1]

    q = q_ref[...]                       # (TB, Q)
    memflat = memflat_ref[...]           # (TB*S, M)
    logmask = logmask_ref[...]           # (TB, S) f32
    bv = bv_ref[0, 0]                    # scalar from SMEM

    wcat = w_ref[...]                    # packed weights (fetched once)
    wq, wu = wcat[:Q], wcat[Q:]
    bcat = b_ref[...]                    # packed f32 biases / v-weight
    bq, bu, wv = bcat[0:1], bcat[1:2], bcat[2:3]

    # --- projections on the MXU, f32 accumulation ----------------------------
    q_proj = jnp.dot(q, wq, preferred_element_type=jnp.float32) + bq        # (TB, A)
    m_proj = jnp.dot(memflat, wu, preferred_element_type=jnp.float32) + bu  # (TB*S, A)
    m_proj = m_proj.reshape(TB, S, A)    # f32 value reshape; layout-free for S % 8 == 0

    # --- tanh(w(q) + u(mem)) --------------------------------------------------
    pre = q_proj[:, None, :] + m_proj                      # (TB, S, A) f32
    if tanh_in_bf16:
        # v6e/v7x only (bf16 EUP): halves vreg pressure of the (TB,S,A) tensor.
        tmp = jnp.tanh(pre.astype(jnp.bfloat16)).astype(jnp.float32)
    else:
        tmp = jnp.tanh(pre)

    # --- score = v(tmp) + bv + log(mask)  (log-bias precomputed in wrapper) ---
    score = jnp.sum(tmp * wv[None, :, :], axis=-1) + bv + logmask   # (TB, S)

    # --- softmax over seq; approx EUP reciprocal is safe because the exact
    #     clip+renormalize below rescales each row uniformly --------------------
    m_max = jnp.max(score, axis=-1, keepdims=True)
    e = jnp.exp(score - m_max)
    p = e * pl.reciprocal(jnp.sum(e, axis=-1, keepdims=True), approx=True)

    # --- clip_and_normalize (final renorm exact) ------------------------------
    p = jnp.clip(p, EPS, 1.0 - EPS)
    w = p / jnp.sum(p, axis=-1, keepdims=True)             # (TB, S) f32

    # --- aggregation: sum_s memory * weights ----------------------------------
    # Mixed-precision multiply (f32 accumulation, no explicit f32 copy of the
    # memory tile).
    # TODO(synk): for production S (>=128) use a batched dot_general
    #   ('bs,bsm->bm', preferred_element_type=f32) to run this on the MXU.
    mem3 = memflat.reshape(TB, S, M)
    aggr = jnp.sum(mem3 * w[:, :, None], axis=1)           # (TB, M) f32

    # --- single lane-dense store: [ aggr | weights | zero pad ] ----------------
    parts = [aggr, w]
    pad = P - (M + S)
    if pad:
        parts.append(jnp.zeros((TB, pad), jnp.float32))
    out_ref[...] = jnp.concatenate(parts, axis=-1).astype(out_ref.dtype)


def _pick_block_b(B, S, M, A, mm_itemsize, vmem_budget_bytes, max_block_b=None):
    """Largest batch tile whose padded, double-buffered VMEM footprint fits.

    Accounts for 32->128 lane padding of the feature dims.  Returns B itself
    (single block) when everything fits, else a multiple-of-8 divisor of B.
    """
    lanes_m = _round_up(max(M, 1), 128)
    lanes_a = _round_up(max(A, 1), 128)
    lanes_o = _round_up(max(M + S, 1), 128)
    per_b = (2 * S * lanes_m * mm_itemsize   # memory tile, double-buffered
             + 2 * lanes_o * 4               # packed output slab, double-buffered
             + S * lanes_m * 4               # f32 weighted-memory temp
             + 3 * S * lanes_a * 4)          # f32 m_proj / pre / tanh temps
    cap = max(1, vmem_budget_bytes // max(per_b, 1))
    if max_block_b is not None:
        cap = min(cap, max_block_b)
    cands = [d for d in range(8, B + 1, 8) if B % d == 0] + [B]
    fitting = [d for d in cands if d <= cap]
    return max(fitting) if fitting else min(cands)


def additive_attention(query, memory, memory_mask, params, *,
                       block_b=None, matmul_dtype=jnp.float32,
                       tanh_in_bf16=False, core_parallel=False,
                       vmem_limit_bytes=32 * 1024 * 1024):
    B, Q = query.shape
    _, S, M = memory.shape
    A = params["wq"].shape[1]
    P = _round_up(M + S, 128)            # lane-dense packed output width

    mm = jnp.dtype(matmul_dtype)
    if block_b is None:
        # Size against the padded VMEM footprint, leaving headroom under the
        # scoped limit.  On v7x (64 MiB physical VMEM) keep vmem_limit_bytes
        # <= ~48 MiB; with core_parallel keep >= 2 grid steps per TensorCore.
        max_bb = B if not core_parallel else max(1, B // 4)
        block_b = _pick_block_b(B, S, M, A, mm.itemsize,
                                vmem_budget_bytes=(vmem_limit_bytes * 5) // 8,
                                max_block_b=max_bb)
    assert B % block_b == 0
    grid = (B // block_b,)

    # Wrapper-side prep: flatten memory, precompute log-mask bias, pack weights.
    q_in = query.astype(mm)
    mem_in = memory.reshape(B * S, M).astype(mm)
    logmask = jnp.where(memory_mask > 0.0,
                        jnp.log(jnp.where(memory_mask > 0.0, memory_mask, 1.0)),
                        jnp.float32(NEG_INF)).astype(jnp.float32)
    wcat = jnp.concatenate([params["wq"], params["wu"]], axis=0).astype(mm)     # (Q+M, A)
    bcat = jnp.concatenate([params["bq"], params["bu"], params["wv"]],
                           axis=0).astype(jnp.float32)                          # (3, A)
    bv = params["bv"].reshape(1, 1).astype(jnp.float32)                         # scalar -> SMEM

    in_specs = [
        pl.BlockSpec((block_b, Q), lambda b: (b, 0)),          # query
        pl.BlockSpec((block_b * S, M), lambda b: (b, 0)),      # memory (flattened rows)
        pl.BlockSpec((block_b, S), lambda b: (b, 0)),          # log-mask
        pl.BlockSpec((Q + M, A), lambda b: (0, 0)),            # packed [wq; wu]
        pl.BlockSpec((3, A), lambda b: (0, 0)),                # packed [bq; bu; wv]
        pl.BlockSpec(memory_space=pltpu.MemorySpace.SMEM),     # bv scalar
    ]
    out_specs = pl.BlockSpec((block_b, P), lambda b: (b, 0))
    out_shape = jax.ShapeDtypeStruct((B, P), jnp.float32)

    if core_parallel:
        # v7x: explicitly split the batch grid across both TensorCores.
        dim_sem = (pltpu.CORE_PARALLEL,)
    else:
        dim_sem = ("parallel",)

    itemsize = mm.itemsize
    cost = pl.CostEstimate(
        flops=2 * B * S * M * A + 2 * B * Q * A + 2 * B * S * A + 2 * B * S * M,
        transcendentals=B * S * A + 2 * B * S,
        bytes_accessed=(B * S * M + B * Q + (Q + M) * A) * itemsize
                       + (B * S + 3 * A + 1 + B * P) * 4,
    )

    out = pl.pallas_call(
        functools.partial(additive_attn_kernel, tanh_in_bf16=tanh_in_bf16),
        grid=grid,
        out_shape=out_shape,
        in_specs=in_specs,
        out_specs=out_specs,
        compiler_params=pltpu.CompilerParams(
            dimension_semantics=dim_sem,
            vmem_limit_bytes=vmem_limit_bytes,
        ),
        cost_estimate=cost,
    )(q_in, mem_in, logmask, wcat, bcat, bv)

    # Slice the packed lane-dense slab back into the two logical outputs.
    aggr = out[:, :M]
    weights = out[:, M:M + S]
    return aggr, weights


def reference(query, memory, memory_mask, params):
    """Pure-JAX f32 reference mirroring the PyTorch forward."""
    q_proj = query @ params["wq"] + params["bq"]                      # (B, A)
    m_proj = jnp.einsum("bsm,ma->bsa", memory, params["wu"]) + params["bu"]
    tmp = jnp.tanh(q_proj[:, None, :] + m_proj)
    score = jnp.einsum("bsa,a->bs", tmp, params["wv"][0]) + params["bv"][0, 0]
    score = score + jnp.log(memory_mask)
    p = jax.nn.softmax(score, axis=-1)
    p = jnp.clip(p, EPS, 1.0 - EPS)
    w = p / jnp.sum(p, axis=-1, keepdims=True)
    aggr = jnp.sum(memory * w[:, :, None], axis=1)
    return aggr, w


if __name__ == "__main__":
    B, S = 16, 8
    QUERY_SIZE, MEMORY_SIZE, ATTN_SIZE = 32, 32, 32

    key = jax.random.PRNGKey(0)
    k_q, k_m, k_wq, k_bq, k_wu, k_bu, k_wv, k_bv = jax.random.split(key, 8)

    query = jax.random.normal(k_q, (B, QUERY_SIZE), dtype=jnp.float32)
    memory = jax.random.normal(k_m, (B, S, MEMORY_SIZE), dtype=jnp.float32)
    # mask: mostly ones with trailing padding positions zeroed out
    memory_mask = jnp.ones((B, S), dtype=jnp.float32)
    memory_mask = memory_mask.at[0, S - 2:].set(0.0)
    memory_mask = memory_mask.at[1, S - 1:].set(0.0)
    memory_mask = memory_mask.at[5, S - 3:].set(0.0)

    def uni(k, shape, fan_in):
        bound = 1.0 / (fan_in ** 0.5)
        return jax.random.uniform(k, shape, jnp.float32, -bound, bound)

    params = {
        "wq": uni(k_wq, (QUERY_SIZE, ATTN_SIZE), QUERY_SIZE),
        "bq": uni(k_bq, (1, ATTN_SIZE), QUERY_SIZE),
        "wu": uni(k_wu, (MEMORY_SIZE, ATTN_SIZE), MEMORY_SIZE),
        "bu": uni(k_bu, (1, ATTN_SIZE), MEMORY_SIZE),
        "wv": uni(k_wv, (1, ATTN_SIZE), ATTN_SIZE),   # v weight, kept as (1, A)
        "bv": uni(k_bv, (1, 1), ATTN_SIZE),
    }

    aggr_ref, weights_ref = reference(query, memory, memory_mask, params)

    # f32 path (default): exact semantics, tight check.
    aggr, weights = additive_attention(query, memory, memory_mask, params)
    jax.block_until_ready((aggr, weights))
    assert aggr.shape == (B, MEMORY_SIZE) and weights.shape == (B, S)
    assert jnp.allclose(aggr, aggr_ref, atol=1e-5, rtol=1e-5)
    assert jnp.allclose(weights, weights_ref, atol=1e-5, rtol=1e-5)

    # bf16 matmul-operand path (halves HBM traffic of the memory tensor;
    # recommended default on v5e, loose check since memory itself is bf16).
    aggr_bf, weights_bf = additive_attention(query, memory, memory_mask, params,
                                             matmul_dtype=jnp.bfloat16)
    jax.block_until_ready((aggr_bf, weights_bf))
    assert jnp.allclose(aggr_bf, aggr_ref, atol=1e-1, rtol=1e-1)
    assert jnp.allclose(weights_bf, weights_ref, atol=1e-1, rtol=1e-1)

    print("KERNEL_OK")
</pallas_src>

<mosaic_0001>
module attributes {stable_mosaic.version = 11 : i64} {
  func.func @additive_attn_kernel(%arg0: i32, %arg1: memref<16x32xf32, #tpu.memory_space<vmem>>, %arg2: memref<128x32xf32, #tpu.memory_space<vmem>>, %arg3: memref<16x8xf32, #tpu.memory_space<vmem>>, %arg4: memref<64x32xf32, #tpu.memory_space<vmem>>, %arg5: memref<3x32xf32, #tpu.memory_space<vmem>>, %arg6: memref<1x1xf32, #tpu.memory_space<smem>>, %arg7: memref<16x128xf32, #tpu.memory_space<vmem>>) attributes {dimension_semantics = [#tpu.dimension_semantics<parallel>], iteration_bounds = array<i64: 1>, scalar_prefetch = 0 : i64, scratch_operands = 0 : i64, tpu.core_type = #tpu.core_type<tc>, window_params = [{transform_indices = @transform_0, window_bounds = array<i64: 16, 32>}, {transform_indices = @transform_1, window_bounds = array<i64: 128, 32>}, {transform_indices = @transform_2, window_bounds = array<i64: 16, 8>}, {pipeline_mode = #tpu.pipeline_mode<synchronous>, transform_indices = @transform_3, window_bounds = array<i64: 64, 32>}, {pipeline_mode = #tpu.pipeline_mode<synchronous>, transform_indices = @transform_4, window_bounds = array<i64: 3, 32>}, {transform_indices = @transform_5, window_bounds = array<i64: 1, 1>}, {transform_indices = @transform_6, window_bounds = array<i64: 16, 128>}]} {
    %c0 = arith.constant 0 : index
    %c0_0 = arith.constant 0 : index
    %0 = vector.load %arg1[%c0, %c0_0] : memref<16x32xf32, #tpu.memory_space<vmem>>, vector<16x32xf32>
    %c0_1 = arith.constant 0 : index
    %c0_2 = arith.constant 0 : index
    %1 = vector.load %arg2[%c0_1, %c0_2] : memref<128x32xf32, #tpu.memory_space<vmem>>, vector<128x32xf32>
    %c0_3 = arith.constant 0 : index
    %c0_4 = arith.constant 0 : index
    %2 = vector.load %arg3[%c0_3, %c0_4] : memref<16x8xf32, #tpu.memory_space<vmem>>, vector<16x8xf32>
    %c0_5 = arith.constant 0 : index
    %c0_6 = arith.constant 0 : index
    %3 = memref.load %arg6[%c0_5, %c0_6] : memref<1x1xf32, #tpu.memory_space<smem>>
    %c0_7 = arith.constant 0 : index
    %c0_8 = arith.constant 0 : index
    %4 = vector.load %arg4[%c0_7, %c0_8] : memref<64x32xf32, #tpu.memory_space<vmem>>, vector<64x32xf32>
    %5 = vector.extract_strided_slice %4 {offsets = [0, 0], sizes = [32, 32], strides = [1, 1]} : vector<64x32xf32> to vector<32x32xf32>
    %6 = vector.extract_strided_slice %4 {offsets = [32, 0], sizes = [32, 32], strides = [1, 1]} : vector<64x32xf32> to vector<32x32xf32>
    %c0_9 = arith.constant 0 : index
    %c0_10 = arith.constant 0 : index
    %7 = vector.load %arg5[%c0_9, %c0_10] : memref<3x32xf32, #tpu.memory_space<vmem>>, vector<3x32xf32>
    %8 = vector.extract_strided_slice %7 {offsets = [0, 0], sizes = [1, 32], strides = [1, 1]} : vector<3x32xf32> to vector<1x32xf32>
    %9 = vector.extract_strided_slice %7 {offsets = [1, 0], sizes = [1, 32], strides = [1, 1]} : vector<3x32xf32> to vector<1x32xf32>
    %10 = vector.extract_strided_slice %7 {offsets = [2, 0], sizes = [1, 32], strides = [1, 1]} : vector<3x32xf32> to vector<1x32xf32>
    %cst = arith.constant dense<0.000000e+00> : vector<16x32xf32>
    %11 = tpu.matmul %0, %5, %cst {dimension_numbers = #tpu.dot_dimension_numbers<[1], [0], [0], [1], [0, 0, 1, 1], [], []>} : vector<16x32xf32>, vector<32x32xf32>, vector<16x32xf32> -> vector<16x32xf32>
    %12 = vector.broadcast %8 : vector<1x32xf32> to vector<16x32xf32>
    %13 = arith.addf %11, %12 : vector<16x32xf32>
    %cst_11 = arith.constant dense<0.000000e+00> : vector<128x32xf32>
    %14 = tpu.matmul %1, %6, %cst_11 {dimension_numbers = #tpu.dot_dimension_numbers<[1], [0], [0], [1], [0, 0, 1, 1], [], []>} : vector<128x32xf32>, vector<32x32xf32>, vector<128x32xf32> -> vector<128x32xf32>
    %15 = vector.broadcast %9 : vector<1x32xf32> to vector<128x32xf32>
    %16 = arith.addf %14, %15 : vector<128x32xf32>
    %17 = vector.shape_cast %16 : vector<128x32xf32> to vector<16x8x32xf32>
    %18 = vector.shape_cast %13 : vector<16x32xf32> to vector<16x1x32xf32>
    %19 = vector.broadcast %18 : vector<16x1x32xf32> to vector<16x8x32xf32>
    %20 = arith.addf %19, %17 : vector<16x8x32xf32>
    %21 = math.tanh %20 : vector<16x8x32xf32>
    %22 = vector.shape_cast %10 : vector<1x32xf32> to vector<1x1x32xf32>
    %23 = vector.broadcast %22 : vector<1x1x32xf32> to vector<16x8x32xf32>
    %24 = arith.mulf %21, %23 : vector<16x8x32xf32>
    %cst_12 = arith.constant dense<0.000000e+00> : vector<16x8xf32>
    %25 = vector.multi_reduction <add>, %24, %cst_12 [2] : vector<16x8x32xf32> to vector<16x8xf32>
    %26 = vector.broadcast %3 : f32 to vector<16x8xf32>
    %27 = arith.addf %25, %26 : vector<16x8xf32>
    %28 = arith.addf %27, %2 : vector<16x8xf32>
    %cst_13 = arith.constant dense<0xFF800000> : vector<16xf32>
    %29 = vector.multi_reduction <maximumf>, %28, %cst_13 [1] : vector<16x8xf32> to vector<16xf32>
    %30 = vector.shape_cast %29 : vector<16xf32> to vector<16x1xf32>
    %31 = vector.broadcast %30 : vector<16x1xf32> to vector<16x8xf32>
    %32 = arith.subf %28, %31 : vector<16x8xf32>
    %33 = math.exp %32 : vector<16x8xf32>
    %cst_14 = arith.constant dense<0.000000e+00> : vector<16xf32>
    %34 = vector.multi_reduction <add>, %33, %cst_14 [1] : vector<16x8xf32> to vector<16xf32>
    %35 = vector.shape_cast %34 : vector<16xf32> to vector<16x1xf32>
    %36 = tpu.reciprocal %35 {approx = true} : vector<16x1xf32> -> vector<16x1xf32>
    %37 = vector.broadcast %36 : vector<16x1xf32> to vector<16x8xf32>
    %38 = arith.mulf %33, %37 : vector<16x8xf32>
    %cst_15 = arith.constant 9.99999974E-6 : f32
    %cst_16 = arith.constant 0.999989986 : f32
    %39 = vector.broadcast %cst_15 : f32 to vector<16x8xf32>
    %40 = arith.maximumf %39, %38 : vector<16x8xf32>
    %41 = vector.broadcast %cst_16 : f32 to vector<16x8xf32>
    %42 = arith.minimumf %41, %40 : vector<16x8xf32>
    %cst_17 = arith.constant dense<0.000000e+00> : vector<16xf32>
    %43 = vector.multi_reduction <add>, %42, %cst_17 [1] : vector<16x8xf32> to vector<16xf32>
    %44 = vector.shape_cast %43 : vector<16xf32> to vector<16x1xf32>
    %45 = vector.broadcast %44 : vector<16x1xf32> to vector<16x8xf32>
    %46 = arith.divf %42, %45 : vector<16x8xf32>
    %47 = vector.shape_cast %1 : vector<128x32xf32> to vector<16x8x32xf32>
    %48 = vector.shape_cast %46 : vector<16x8xf32> to vector<16x8x1xf32>
    %49 = vector.broadcast %48 : vector<16x8x1xf32> to vector<16x8x32xf32>
    %50 = arith.mulf %47, %49 : vector<16x8x32xf32>
    %cst_18 = arith.constant dense<0.000000e+00> : vector<16x32xf32>
    %51 = vector.multi_reduction <add>, %50, %cst_18 [1] : vector<16x8x32xf32> to vector<16x32xf32>
    %cst_19 = arith.constant 0.000000e+00 : f32
    %52 = vector.broadcast %cst_19 : f32 to vector<16x88xf32>
    %53 = tpu.concatenate %51, %46, %52 in 1 : vector<16x32xf32>, vector<16x8xf32>, vector<16x88xf32> -> vector<16x128xf32>
    %c0_20 = arith.constant 0 : index
    %c0_21 = arith.constant 0 : index
    %54 = vector.load %arg7[%c0_20, %c0_21] : memref<16x128xf32, #tpu.memory_space<vmem>>, vector<16x128xf32>
    tpu.vector_store %arg7[%c0_20, %c0_21], %53 {strides = array<i32>} : memref<16x128xf32, #tpu.memory_space<vmem>>, vector<16x128xf32>,
    return
  }
  func.func @transform_0(%arg0: i32) -> (i32, i32) {
    %c0_i32 = arith.constant 0 : i32
    %c0_i32_0 = arith.constant 0 : i32
    return %arg0, %c0_i32 : i32, i32
  }
  func.func @transform_1(%arg0: i32) -> (i32, i32) {
    %c0_i32 = arith.constant 0 : i32
    %c0_i32_0 = arith.constant 0 : i32
    return %arg0, %c0_i32 : i32, i32
  }
  func.func @transform_2(%arg0: i32) -> (i32, i32) {
    %c0_i32 = arith.constant 0 : i32
    %c0_i32_0 = arith.constant 0 : i32
    return %arg0, %c0_i32 : i32, i32
  }
  func.func @transform_3(%arg0: i32) -> (i32, i32) {
    %c0_i32 = arith.constant 0 : i32
    %c0_i32_0 = arith.constant 0 : i32
    %c0_i32_1 = arith.constant 0 : i32
    return %c0_i32, %c0_i32_0 : i32, i32
  }
  func.func @transform_4(%arg0: i32) -> (i32, i32) {
    %c0_i32 = arith.constant 0 : i32
    %c0_i32_0 = arith.constant 0 : i32
    %c0_i32_1 = arith.constant 0 : i32
    return %c0_i32, %c0_i32_0 : i32, i32
  }
  func.func @transform_5(%arg0: i32) -> (i32, i32) {
    %c0_i32 = arith.constant 0 : i32
    %c0_i32_0 = arith.constant 0 : i32
    %c0_i32_1 = arith.constant 0 : i32
    return %c0_i32, %c0_i32_0 : i32, i32
  }
  func.func @transform_6(%arg0: i32) -> (i32, i32) {
    %c0_i32 = arith.constant 0 : i32
    %c0_i32_0 = arith.constant 0 : i32
    return %arg0, %c0_i32 : i32, i32
  }
}

</mosaic_0001>

<bundles_post_ra>
// kernel: tpu_custom_call.1
= control target key start
LH: loop header
LB: loop body
LE: loop exit
PB: predicated region body
PF: predicated region fallthrough
CT: control target
= control target key end

     0   :  { %vm59_vm0 = vcmask 261120   ;;  %v55_v3 = vlaneseq  ;;  %s3103_s0 = inlined_call_operand.vmem [shape: f32[16,32], index: 0, kind: input, shape index: {}]   ;;  %s3104_s1 = inlined_call_operand.vmem [shape: f32[128,32], index: 1, kind: input, shape index: {}]   ;;  %s3105_s2 = inlined_call_operand.vmem [shape: f32[16,8], index: 2, kind: input, shape index: {}]   ;;  %s3106_s3 = inlined_call_operand.vmem [shape: f32[64,32], index: 3, kind: input, shape index: {}]   ;;  %s3107_s4 = inlined_call_operand.vmem [shape: f32[3,32], index: 4, kind: input, shape index: {}]   ;;  %s3108_s5 = inlined_call_operand.<no memory space> [shape: f32[1,1], index: 5, kind: input, shape index: {}]   ;;  %s3109_s6 = inlined_call_operand.hbm [shape: f32[16,128], index: 6, kind: output, shape index: {}]  }
   0x1   :  { %v46_v0 = vld [vmem:[%s3106_s3] sm:$0xff]  ;;  %v47_v1 = vld [vmem:[%s3106_s3 + $0x8] sm:$0xff]  ;;  %v48_v6 = vld [vmem:[%s3106_s3 + $0x10] sm:$0xff] }
   0x2   :  { %v50_v2 = vld [vmem:[%s3106_s3 + $0x20] sm:$0xff]  ;;  %v2048_v4 = vpack.c.bf16 %v47_v1, %v46_v0  ;;  %v51_v5 = vld [vmem:[%s3106_s3 + $0x28] sm:$0xff]  ;;  %v49_v7 = vld [vmem:[%s3106_s3 + $0x18] sm:$0xff]  ;;  %v2283_v13 = vshrl.u32 %v55_v3, 7 }
   0x3   :  { %v2056_v8 = vpack.c.bf16 %v51_v5, %v50_v2  ;;  %v2052_v9 = vpack.c.bf16 %v49_v7, %v48_v6  ;;  %v52_v10 = vld [vmem:[%s3106_s3 + $0x30] sm:$0xff]  ;;  %v53_v11 = vld [vmem:[%s3106_s3 + $0x38] sm:$0xff]  ;;  %v25_v12 = vld [vmem:[%s3103_s0] sm:$0xff] }
   0x4   :  { %2049 = vmatprep.subr.bf16.mxu0 %v2048_v4  ;;  %v2060_v14 = vpack.c.bf16 %v53_v11, %v52_v10  ;;  %2013 = vmatprep.mubr.msk.f32.mxu0 %vm59_vm0, %v25_v12  ;;  %v33_v15 = vld [vmem:[%s3104_s1 + $0x30] sm:$0xff]  ;;  %v2290_v16 = vsub.s32 1, %v2283_v13  ;;  %v2294_v17 = vsub.s32 0, %v2283_v13  ;;  %v26_v18 = vld [vmem:[%s3103_s0 + $0x8] sm:$0xff]  ;;  %v2302_v19 = vld [vmem:[%s3105_s2] sm:$0xff] }
   0x5   :  { %2064 = vmatprep.subr.bf16.mxu1 %v2056_v8  ;;  %2051 = vmatpush3.bf16.msra.mxu0 %v2048_v4  ;;  %v34_v20 = vld [vmem:[%s3104_s1 + $0x38] sm:$0xff]  ;;  %v2312_v22 = vld [vmem:[%s3105_s2 + $0x8] sm:$0xff] }
   0x6   :  { %2066 = vmatpush3.bf16.msra.mxu1 %v2056_v8  ;;  %2053 = vmatprep.subr.bf16.mxu0 %v2052_v9  ;;  %v647_v21 = vrot.slane %v2302_v19, %v2290_v16 }
   0x7   :  { %2065 = vmatprep.subr.bf16.mxu1 %v2060_v14  ;;  %2033 = vmatprep.mubr.msk.f32.mxu1 %vm59_vm0, %v33_v15 }
   0x9   :  { %2055 = vmatpush3.bf16.msra.mxu0 %v2052_v9 }
   0xa   :  { %2067 = vmatpush3.bf16.msra.mxu1 %v2060_v14  ;;  %2057 = vmatprep.subr.bf16.mxu0 %v2056_v8 }
   0xb   :  { %12 = vsyncpa [#allocation4], 0  ;;  %v35_v23 = vld [vmem:[%s3104_s1 + $0x40] sm:$0xff]  ;;  %v640_v24 = vrot.slane %v2302_v19, %v2294_v17  ;;  %649 = vbcast.lane.b32.xlu1 %v647_v21, 256  ;;  %v696_v26 = vrot.slane %v2312_v22, %v2294_v17  ;;  %v2327_v27 = vsub.s32 2, %v2283_v13  ;;  %v36_v28 = vld [vmem:[%s3104_s1 + $0x48] sm:$0xff]  ;;  %v703_v31 = vrot.slane %v2312_v22, %v2290_v16 }
   0xc   :  { %2014 = vmatmul.mubr.msk.f32.vlgmr.msra.gmra.mrb[0].mxu0 %vm59_vm0, %v26_v18  ;;  %v27_v25 = vld [vmem:[%s3104_s1] sm:$0xff]  ;;  %v37_v29 = vld [vmem:[%s3104_s1 + $0x50] sm:$0xff]  ;;  %v28_v32 = vld [vmem:[%s3104_s1 + $0x8] sm:$0xff]  ;;  %v2346_v33 = vsub.s32 3, %v2283_v13  ;;  %v2369_v40 = vsub.s32 4, %v2283_v13  ;;  %v2392_v47 = vsub.s32 5, %v2283_v13 }
   0xd   :  { %2034 = vmatmul.mubr.msk.f32.vlgmr.msra.gmra.mrb[0].mxu1 %vm59_vm0, %v34_v20  ;;  %2059 = vmatpush3.bf16.msra.mxu0 %v2056_v8  ;;  %v654_v30 = vrot.slane %v2302_v19, %v2327_v27  ;;  %v38_v34 = vld [vmem:[%s3104_s1 + $0x58] sm:$0xff]  ;;  %v29_v35 = vld [vmem:[%s3104_s1 + $0x10] sm:$0xff]  ;;  %v39_v36 = vld [vmem:[%s3104_s1 + $0x60] sm:$0xff]  ;;  %v710_v38 = vrot.slane %v2312_v22, %v2327_v27  ;;  %v2405_v51 = vsub.s32 6, %v2283_v13  ;;  %v2215_v55 = vmov 1966171168  }
   0xe   :  { %2036 = vmatprep.mubr.msk.f32.mxu1 %vm59_vm0, %v35_v23  ;;  %2061 = vmatprep.subr.bf16.mxu0 %v2060_v14  ;;  %v661_v37 = vrot.slane %v2302_v19, %v2346_v33  ;;  %v30_v39 = vld [vmem:[%s3104_s1 + $0x18] sm:$0xff]  ;;  %v40_v41 = vld [vmem:[%s3104_s1 + $0x68] sm:$0xff]  ;;  %v31_v42 = vld [vmem:[%s3104_s1 + $0x20] sm:$0xff]  ;;  %v668_v44 = vrot.slane %v2302_v19, %v2369_v40  ;;  %v717_v45 = vrot.slane %v2312_v22, %v2346_v33  ;;  %v342_v56 = vunpack.c.l.s4 %v2215_v55 }
   0xf   :  { %2024 = vmatprep.mubr.msk.f32.mxu0 %vm59_vm0, %v27_v25  ;;  %642 = vbcast.lane.b32.xlu0 %v640_v24, 256  ;;  %v41_v43 = vld [vmem:[%s3104_s1 + $0x70] sm:$0xff]  ;;  %v32_v46 = vld [vmem:[%s3104_s1 + $0x28] sm:$0xff]  ;;  %v42_v48 = vld [vmem:[%s3104_s1 + $0x78] sm:$0xff]  ;;  %v675_v49 = vrot.slane %v2302_v19, %v2392_v47  ;;  %v724_v50 = vrot.slane %v2312_v22, %v2369_v40  ;;  %v682_v52 = vrot.slane %v2302_v19, %v2405_v51  ;;  %vm911_vm1 = vcmask 1041409  }
  0x10   :  { %698 = vbcast.lane.b32.xlu1 %v696_v26, 256  ;;  %v731_v53 = vrot.slane %v2312_v22, %v2392_v47  ;;  %v738_v54 = vrot.slane %v2312_v22, %v2405_v51  ;;  %v54_v57 = vld [vmem:[%s3107_s4] sm:$0x7]  ;;  %v343_v58 = vunpack.c.0.s8 %v342_v56  ;;  %vm913_vm2 = vcmask 1042434  }
  0x11   :  { %2037 = vmatmul.mubr.msk.f32.gmra.mrb[2].mxu1 %vm59_vm0, %v36_v28  ;;  %2063 = vmatpush3.bf16.msra.mxu0 %v2060_v14  ;;  %v58_v59 = vrot.slane %v54_v57, %v2294_v17  ;;  %v2423_v1 = vrot.slane %v54_v57, %v2290_v16  ;;  %vm915_vm3 = vcmask 1043459   ;;  %vm917_vm4 = vcmask 1044484  }
  0x12   :  { %2039 = vmatprep.mubr.msk.f32.mxu1 %vm59_vm0, %v37_v29  ;;  %v2418_v60 = vsub.s32 %v343_v58, %v2283_v13  ;;  %vm919_vm5 = vcmask 1045509   ;;  %vm921_vm6 = vcmask 1046534   ;;  %vm923_vm7 = vcmask 1047559  }
  0x13   :  { %656 = vbcast.lane.b32.xlu0 %v654_v30, 256  ;;  %vm934_vm8 = vcmask 64512   ;;  %vm1940_vm9 = vcmask 326656  }
  0x14   :  { %2025 = vmatmul.mubr.msk.f32.vlgmr.msra.gmra.mrb[2].mxu0 %vm59_vm0, %v28_v32  ;;  %705 = vbcast.lane.b32.xlu1 %v703_v31, 256 }
  0x15   :  { %2040 = vmatmul.mubr.msk.f32.gmra.mrb[4].mxu1 %vm59_vm0, %v38_v34  ;;  %2027 = vmatprep.mubr.msk.f32.mxu0 %vm59_vm0, %v29_v35 }
  0x16   :  { %2042 = vmatprep.mubr.msk.f32.mxu1 %vm59_vm0, %v39_v36 }
  0x17   :  { %663 = vbcast.lane.b32.xlu0 %v661_v37, 256 }
  0x18   :  { %2028 = vmatmul.mubr.msk.f32.gmra.mrb[4].mxu0 %vm59_vm0, %v30_v39  ;;  %712 = vbcast.lane.b32.xlu1 %v710_v38, 256 }
  0x19   :  { %2043 = vmatmul.mubr.msk.f32.gmra.mrb[6].mxu1 %vm59_vm0, %v40_v41  ;;  %2030 = vmatprep.mubr.msk.f32.mxu0 %vm59_vm0, %v31_v42 }
  0x1a   :  { %2045 = vmatprep.mubr.msk.f32.mxu1 %vm59_vm0, %v41_v43 }
  0x1b   :  { %670 = vbcast.lane.b32.xlu0 %v668_v44, 256 }
  0x1c   :  { %2031 = vmatmul.mubr.msk.f32.gmra.mrb[6].mxu0 %vm59_vm0, %v32_v46  ;;  %719 = vbcast.lane.b32.xlu1 %v717_v45, 256 }
  0x1d   :  { %2046 = vmatmul.mubr.msk.f32.gmra.mrb[8].mxu1 %vm59_vm0, %v42_v48 }
  0x1f   :  { %677 = vbcast.lane.b32.xlu0 %v675_v49, 256 }
  0x20   :  { %726 = vbcast.lane.b32.xlu1 %v724_v50, 256 }
  0x23   :  { %684 = vbcast.lane.b32.xlu0 %v682_v52, 256 }
  0x24   :  { %733 = vbcast.lane.b32.xlu1 %v731_v53, 256 }
  0x28   :  { %740 = vbcast.lane.b32.xlu1 %v738_v54, 256 }
  0xdf   :  { %v2015_v61 = vpop.f32.mrb[0].mxu0 }
  0xe0   :  { %v138_v62 = vadd.f32 %v2015_v61, %v58_v59  ;;  %v2420_v63 = vpop.f32.mrb[0].mxu1  ;;  %v132_v0 = vpop.f32.mrb[1].mxu0 }
  0xe1   :  { %v133_v2 = vadd.f32 %v132_v0, %v58_v59  ;;  %v289_v4 = vpop.f32.mrb[1].mxu1  ;;  %v2456_v0 = vrot.slane %v54_v57, %v2327_v27 }
  0xe2   :  { %v389_v5 = vcombine.high %v138_v62, %v138_v62  ;;  %v396_v6 = vrot.slane %v138_v62, %v2418_v60  ;;  %v290_v20 = vadd.f32 %v289_v4, %v2423_v1 }
  0xe3   :  { %v340_v7 = vcombine.high %v133_v2, %v133_v2  ;;  %v347_v8 = vrot.slane %v133_v2, %v2418_v60 }
  0xe4   :  { %v403_v9 = vrot.slane %v389_v5, %v2418_v60  ;;  %v404_v10 = vcombine.high %v396_v6, %v396_v6  ;;  %v412_v11 = vrot.slane %v396_v6, %v2418_v60  ;;  %v2038_v12 = vpop.f32.mrb[2].mxu1 }
  0xe5   :  { %v2430_v14 = vrot.slane %v340_v7, %v2418_v60  ;;  %v355_v15 = vcombine.high %v347_v8, %v347_v8  ;;  %v363_v18 = vrot.slane %v347_v8, %v2418_v60  ;;  %v299_v21 = vpop.f32.mrb[3].mxu1  ;;  %v305_v23 = vadd.f32 %v2038_v12, %v2423_v1 }
  0xe6   :  { %v426_v24 = vrot.slane %v404_v10, %v2418_v60  ;;  %v300_v25 = vadd.f32 %v299_v21, %v2423_v1  ;;  %v473_v26 = vrot.slane %v412_v11, %v2294_v17  ;;  %v405_v28 = vcombine.high %v403_v9, %v403_v9 }
  0xe7   :  { %v2440_v29 = vrot.slane %v2430_v14, %v2418_v60  ;;  %v2026_v30 = vpop.f32.mrb[2].mxu0  ;;  %v377_v31 = vrot.slane %v355_v15, %v2418_v60  ;;  %v441_v32 = vrot.slane %v363_v18, %v2294_v17  ;;  %v434_v54 = vcombine.high %v412_v11, %v412_v11 }
  0xe8   :  { %v477_v34 = vrot.slane %v426_v24, %v2294_v17  ;;  %v526_v35 = vadd.f32 %v473_v26, %v300_v25  ;;  %v265_v36 = vadd.f32 %v2026_v30, %v2423_v1  ;;  %v2041_v37 = vpop.f32.mrb[4].mxu1  ;;  %v436_v38 = vcombine.high %v426_v24, %v426_v24  ;;  %v259_v39 = vpop.f32.mrb[3].mxu0 }
  0xe9   :  { %v386_v41 = vcombine.high %v2440_v29, %v2440_v29  ;;  %v445_v42 = vrot.slane %v377_v31, %v2294_v17  ;;  %v315_v43 = vadd.f32 %v2041_v37, %v2423_v1  ;;  %v260_v44 = vadd.f32 %v259_v39, %v2423_v1  ;;  %v309_v45 = vpop.f32.mrb[5].mxu1 }
  0xea   :  { %v527_v46 = vadd.f32 %v477_v34, %v305_v23  ;;  %2075 = vtanh.f32 %v526_v35  ;;  %v485_v48 = vrot.slane %v436_v38, %v2294_v17  ;;  %v310_v49 = vadd.f32 %v309_v45, %v2423_v1 }
  0xeb   :  { %v465_v50 = vrot.slane %v386_v41, %v2294_v17  ;;  %v519_v52 = vadd.f32 %v445_v42, %v265_v36  ;;  %v518_v53 = vadd.f32 %v441_v32, %v260_v44  ;;  %v2029_v55 = vpop.f32.mrb[4].mxu0  ;;  %v387_v59 = vcombine.high %v377_v31, %v377_v31 }
  0xec   :  { %2077 = vtanh.f32 %v527_v46  ;;  %v529_v56 = vadd.f32 %v485_v48, %v315_v43  ;;  %v275_v58 = vadd.f32 %v2029_v55, %v2423_v1  ;;  %v2044_v61 = vpop.f32.mrb[6].mxu1  ;;  %v269_v62 = vpop.f32.mrb[5].mxu0  ;;  %v356_v2 = vcombine.high %v2430_v14, %v2430_v14 }
  0xed   :  { %v524_v4 = vadd.f32 %v465_v50, %v290_v20  ;;  %v481_v5 = vrot.slane %v434_v54, %v2294_v17  ;;  %v319_v6 = vpop.f32.mrb[7].mxu1  ;;  %2079 = vtanh.f32 %v519_v52  ;;  %v453_v7 = vrot.slane %v387_v59, %v2294_v17 }
  0xee   :  { %v325_v8 = vadd.f32 %v2044_v61, %v2423_v1  ;;  %v433_v10 = vrot.slane %v405_v28, %v2418_v60  ;;  %v270_v12 = vadd.f32 %v269_v62, %v2423_v1  ;;  %v385_v15 = vcombine.high %v363_v18, %v363_v18 }
  0xef   :  { %v528_v11 = vadd.f32 %v481_v5, %v310_v49  ;;  %v320_v57 = vadd.f32 %v319_v6, %v2423_v1  ;;  %v2032_v21 = vpop.f32.mrb[6].mxu0  ;;  %2081 = vtanh.f32 %v518_v53  ;;  %v521_v14 = vadd.f32 %v453_v7, %v275_v58 }
  0xf0   :  { %v493_v20 = vrot.slane %v433_v10, %v2294_v17  ;;  %v419_v23 = vrot.slane %v403_v9, %v2418_v60  ;;  %v2047_v24 = vpop.f32.mrb[8].mxu1  ;;  %v279_v25 = vpop.f32.mrb[7].mxu0  ;;  %v449_v26 = vrot.slane %v385_v15, %v2294_v17  ;;  %v285_v28 = vadd.f32 %v2032_v21, %v2423_v1 }
  0xf1   :  { %2083 = vtanh.f32 %v528_v11  ;;  %v384_v30 = vrot.slane %v356_v2, %v2418_v60  ;;  %v329_v31 = vpop.f32.mrb[9].mxu1  ;;  %v335_v34 = vadd.f32 %v2047_v24, %v2423_v1  ;;  %v437_v37 = vcombine.high %v433_v10, %v433_v10 }
  0xf2   :  { %2085 = vtanh.f32 %v529_v56  ;;  %v531_v18 = vadd.f32 %v493_v20, %v325_v8  ;;  %v489_v32 = vrot.slane %v419_v23, %v2294_v17  ;;  %v520_v35 = vadd.f32 %v449_v26, %v270_v12 }
  0xf3   :  { %v388_v36 = vcombine.high %v384_v30, %v384_v30  ;;  %v461_v9 = vrot.slane %v384_v30, %v2294_v17  ;;  %2087 = vtanh.f32 %v524_v4  ;;  %v280_v41 = vadd.f32 %v279_v25, %v2423_v1 }
  0xf4   :  { %v2076_v38 = vpop.eup %2075  ;;  %v530_v39 = vadd.f32 %v489_v32, %v320_v57  ;;  %v457_v60 = vrot.slane %v2440_v29, %v2294_v17  ;;  %v295_v42 = vadd.f32 %v2420_v63, %v2423_v1  ;;  %v501_v45 = vrot.slane %v437_v37, %v2294_v17 }
  0xf5   :  { %v469_v43 = vrot.slane %v388_v36, %v2294_v17  ;;  %v523_v44 = vadd.f32 %v461_v9, %v285_v28  ;;  %v330_v49 = vadd.f32 %v329_v31, %v2423_v1  ;;  %v435_v50 = vcombine.high %v419_v23, %v419_v23 }
  0xf6   :  { %v2078_v46 = vpop.eup %2077  ;;  %v522_v48 = vadd.f32 %v457_v60, %v280_v41  ;;  %2089 = vtanh.f32 %v521_v14  ;;  %v533_v53 = vadd.f32 %v501_v45, %v335_v34  ;;  %v562_v54 = vmul.f32 %v2076_v38, %v2456_v0 }
  0xf7   :  { %v525_v52 = vadd.f32 %v469_v43, %v295_v42  ;;  %v2080_v55 = vpop.eup %2079  ;;  %2091 = vtanh.f32 %v531_v18  ;;  %v497_v29 = vrot.slane %v435_v50, %v2294_v17  ;;  %v563_v56 = vmul.f32 %v2078_v46, %v2456_v0 }
  0xf8   :  { %v594_v63 = vsel %vm59_vm0, %v562_v54, 0.0  ;;  %2093 = vtanh.f32 %v520_v35  ;;  %v555_v5 = vmul.f32 %v2080_v55, %v2456_v0  ;;  %v2516_v50 = vsub.s32 7, %v2283_v13  ;;  %v650_v54 = vpop.permute.xlu1 %649 }
  0xf9   :  { %v2082_v58 = vpop.eup %2081  ;;  %v532_v59 = vadd.f32 %v497_v29, %v330_v49  ;;  %595 = vadd.xlane.f32.xlu1 %v594_v63  ;;  %2095 = vtanh.f32 %v530_v39  ;;  %v597_v4 = vsel %vm59_vm0, %v563_v56, 0.0  ;;  %v2216_v39 = vmov 0  }
  0xfa   :  { %v554_v1 = vmul.f32 %v2082_v58, %v2456_v0  ;;  %2097 = vtanh.f32 %v525_v52  ;;  %v573_v10 = vsel %vm59_vm0, %v555_v5, 0.0  ;;  %2073 = vset.pattern.permute.xlu1 %v2216_v39  ;;  %2074 = vset.pattern.permute.xlu0 %v2216_v39  ;;  %v745_v52 = vrot.slane %v2312_v22, %v2516_v50 }
  0xfb   :  { %v2084_v61 = vpop.eup %2083  ;;  %2099 = vtanh.f32 %v533_v53  ;;  %v689_v53 = vrot.slane %v2302_v19, %v2516_v50  ;;  %v2527_v22 = vstv %s3108_s5 }
  0xfc   :  { %v2086_v62 = vpop.eup %2085  ;;  %v570_v2 = vsel %vm59_vm0, %v554_v1, 0.0  ;;  %v564_v6 = vmul.f32 %v2084_v61, %v2456_v0  ;;  %2101 = vtanh.f32 %v523_v44  ;;  %v699_v55 = vpop.permute.xlu1 %698 }
  0xfd   :  { %v2088_v7 = vpop.eup %2087  ;;  %571 = vadd.xlane.f32.xlu0 %v570_v2  ;;  %598 = vadd.xlane.f32.xlu1 %v597_v4  ;;  %v565_v15 = vmul.f32 %v2086_v62, %v2456_v0  ;;  %2103 = vtanh.f32 %v532_v59 }
  0xfe   :  { %v600_v11 = vsel %vm59_vm0, %v564_v6, 0.0  ;;  %v560_v12 = vmul.f32 %v2088_v7, %v2456_v0  ;;  %2105 = vtanh.f32 %v522_v48 }
  0xff   :  { %v603_v20 = vsel %vm59_vm0, %v565_v15, 0.0 }
 0x100   :  { %v2090_v8 = vpop.eup %2089  ;;  %v588_v14 = vsel %vm59_vm0, %v560_v12, 0.0  ;;  %v706_v29 = vpop.permute.xlu1 %705 }
 0x101   :  { %v2092_v57 = vpop.eup %2091  ;;  %574 = vadd.xlane.f32.xlu0 %v573_v10  ;;  %601 = vadd.xlane.f32.xlu1 %v600_v11  ;;  %v557_v23 = vmul.f32 %v2090_v8, %v2456_v0 }
 0x102   :  { %v2094_v21 = vpop.eup %2093  ;;  %v567_v24 = vmul.f32 %v2092_v57, %v2456_v0 }
 0x103   :  { %v2096_v25 = vpop.eup %2095  ;;  %v579_v28 = vsel %vm59_vm0, %v557_v23, 0.0  ;;  %v556_v31 = vmul.f32 %v2094_v21, %v2456_v0 }
 0x104   :  { %v2098_v26 = vpop.eup %2097  ;;  %v609_v30 = vsel %vm59_vm0, %v567_v24, 0.0  ;;  %v566_v18 = vmul.f32 %v2096_v25, %v2456_v0  ;;  %v713_v63 = vpop.permute.xlu1 %712 }
 0x105   :  { %589 = vadd.xlane.f32.xlu0 %v588_v14  ;;  %604 = vadd.xlane.f32.xlu1 %v603_v20  ;;  %v2100_v32 = vpop.eup %2099  ;;  %v576_v35 = vsel %vm59_vm0, %v556_v31, 0.0  ;;  %v561_v9 = vmul.f32 %v2098_v26, %v2456_v0 }
 0x106   :  { %v2102_v34 = vpop.eup %2101  ;;  %v606_v36 = vsel %vm59_vm0, %v566_v18, 0.0  ;;  %v569_v37 = vmul.f32 %v2100_v32, %v2456_v0 }
 0x107   :  { %v2104_v38 = vpop.eup %2103  ;;  %v591_v41 = vsel %vm59_vm0, %v561_v9, 0.0  ;;  %v559_v42 = vmul.f32 %v2102_v34, %v2456_v0 }
 0x108   :  { %v615_v60 = vsel %vm59_vm0, %v569_v37, 0.0  ;;  %v568_v43 = vmul.f32 %v2104_v38, %v2456_v0  ;;  %v2106_v44 = vpop.eup %2105  ;;  %v720_v58 = vpop.permute.xlu1 %719 }
 0x109   :  { %580 = vadd.xlane.f32.xlu0 %v579_v28  ;;  %610 = vadd.xlane.f32.xlu1 %v609_v30  ;;  %v585_v45 = vsel %vm59_vm0, %v559_v42, 0.0  ;;  %v558_v48 = vmul.f32 %v2106_v44, %v2456_v0  ;;  %v643_v0 = vpop.permute.xlu0 %642 }
 0x10a   :  { %v612_v46 = vsel %vm59_vm0, %v568_v43, 0.0 }
 0x10b   :  { %v582_v49 = vsel %vm59_vm0, %v558_v48, 0.0 }
 0x10c   :  { %v727_v61 = vpop.permute.xlu1 %726 }
 0x10d   :  { %577 = vadd.xlane.f32.xlu0 %v576_v35  ;;  %607 = vadd.xlane.f32.xlu1 %v606_v36  ;;  %v657_v56 = vpop.permute.xlu0 %656 }
 0x110   :  { %v734_v62 = vpop.permute.xlu1 %733 }
 0x111   :  { %592 = vadd.xlane.f32.xlu0 %v591_v41  ;;  %616 = vadd.xlane.f32.xlu1 %v615_v60  ;;  %v664_v59 = vpop.permute.xlu0 %663 }
 0x114   :  { %v741_v4 = vpop.permute.xlu1 %740 }
 0x115   :  { %586 = vadd.xlane.f32.xlu0 %v585_v45  ;;  %613 = vadd.xlane.f32.xlu1 %v612_v46  ;;  %v2522_v1 = vpop.permute.xlu0 %670 }
 0x119   :  { %583 = vadd.xlane.f32.xlu0 %v582_v49  ;;  %v678_v2 = vpop.permute.xlu0 %677 }
 0x11d   :  { %v685_v19 = vpop.permute.xlu0 %684 }
 0x126   :  { %747 = vbcast.lane.b32.xlu1 %v745_v52, 256 }
 0x12f   :  { %691 = vbcast.lane.b32.xlu0 %v689_v53, 256 }
 0x186   :  { %v596_v5 = vpop.xlane.xlu1 %595 }
 0x187   :  { %v627_v6 = vadd.f32 %v2527_v22, %v596_v5 }
 0x189   :  { %v2530_v7 = vadd.f32 %v699_v55, %v627_v6 }
 0x18a   :  { %v572_v8 = vpop.xlane.xlu0 %571  ;;  %v599_v10 = vpop.xlane.xlu1 %598 }
 0x18b   :  { %v628_v11 = vadd.f32 %v2527_v22, %v599_v10  ;;  %822 = vperm.xlu1 %2073, %v2530_v7   ;;  %v619_v12 = vadd.f32 %v2527_v22, %v572_v8 }
 0x18d   :  { %v2535_v15 = vadd.f32 %v706_v29, %v628_v11  ;;  %v2539_v20 = vadd.f32 %v643_v0, %v619_v12  ;;  %v2595_v11 = vand.u32 127, %v55_v3 }
 0x18e   :  { %v575_v57 = vpop.xlane.xlu0 %574  ;;  %v602_v21 = vpop.xlane.xlu1 %601 }
 0x18f   :  { %v620_v14 = vadd.f32 %v2527_v22, %v575_v57  ;;  %825 = vperm.xlu0 %2074, %v2535_v15   ;;  %v629_v24 = vadd.f32 %v2527_v22, %v602_v21  ;;  %v2599_v57 = vsub.s32 %v2595_v11, %v2283_v13 }
 0x191   :  { %v2541_v23 = vadd.f32 %v650_v54, %v620_v14  ;;  %v2547_v30 = vadd.f32 %v713_v63, %v629_v24 }
 0x192   :  { %v590_v25 = vpop.xlane.xlu0 %589  ;;  %v605_v26 = vpop.xlane.xlu1 %604 }
 0x193   :  { %v625_v28 = vadd.f32 %v2527_v22, %v590_v25  ;;  %801 = vperm.xlu1 %2073, %v2541_v23   ;;  %798 = vperm.xlu0 %2074, %v2539_v20   ;;  %v630_v18 = vadd.f32 %v2527_v22, %v605_v26 }
 0x195   :  { %v2549_v31 = vadd.f32 %v685_v19, %v625_v28  ;;  %v2555_v36 = vadd.f32 %v720_v58, %v630_v18 }
 0x196   :  { %v581_v32 = vpop.xlane.xlu0 %580  ;;  %v611_v34 = vpop.xlane.xlu1 %610 }
 0x197   :  { %v622_v35 = vadd.f32 %v2527_v22, %v581_v32  ;;  %816 = vperm.xlu1 %2073, %v2549_v31   ;;  %828 = vperm.xlu0 %2074, %v2547_v30   ;;  %v632_v37 = vadd.f32 %v2527_v22, %v611_v34 }
 0x199   :  { %v2557_v9 = vadd.f32 %v664_v59, %v622_v35  ;;  %v2563_v60 = vadd.f32 %v734_v62, %v632_v37 }
 0x19a   :  { %v578_v38 = vpop.xlane.xlu0 %577  ;;  %v608_v39 = vpop.xlane.xlu1 %607 }
 0x19b   :  { %v621_v41 = vadd.f32 %v2527_v22, %v578_v38  ;;  %807 = vperm.xlu1 %2073, %v2557_v9   ;;  %831 = vperm.xlu0 %2074, %v2555_v36   ;;  %v631_v43 = vadd.f32 %v2527_v22, %v608_v39 }
 0x19d   :  { %v2565_v42 = vadd.f32 %v657_v56, %v621_v41  ;;  %v2570_v46 = vadd.f32 %v727_v61, %v631_v43 }
 0x19e   :  { %v593_v44 = vpop.xlane.xlu0 %592  ;;  %v617_v45 = vpop.xlane.xlu1 %616 }
 0x19f   :  { %804 = vperm.xlu1 %2073, %v2565_v42   ;;  %837 = vperm.xlu0 %2074, %v2563_v60   ;;  %v634_v63 = vadd.f32 %v2527_v22, %v617_v45  ;;  %v626_v62 = vadd.f32 %v2527_v22, %v593_v44 }
 0x1a2   :  { %v587_v48 = vpop.xlane.xlu0 %586  ;;  %v614_v49 = vpop.xlane.xlu1 %613 }
 0x1a3   :  { %v624_v52 = vadd.f32 %v2527_v22, %v587_v48  ;;  %v633_v53 = vadd.f32 %v2527_v22, %v614_v49  ;;  %834 = vperm.xlu0 %2074, %v2570_v46  }
 0x1a5   :  { %v2575_v54 = vadd.f32 %v678_v2, %v624_v52  ;;  %v2577_v55 = vadd.f32 %v741_v4, %v633_v53 }
 0x1a6   :  { %v584_v29 = vpop.xlane.xlu0 %583  ;;  %v748_v0 = vpop.permute.xlu1 %747 }
 0x1a7   :  { %v623_v56 = vadd.f32 %v2527_v22, %v584_v29  ;;  %813 = vperm.xlu1 %2073, %v2575_v54   ;;  %840 = vperm.xlu0 %2074, %v2577_v55   ;;  %v2586_v59 = vadd.f32 %v748_v0, %v634_v63 }
 0x1a9   :  { %v2584_v58 = vadd.f32 %v2522_v1, %v623_v56 }
 0x1aa   :  { %v692_v61 = vpop.permute.xlu0 %691 }
 0x1ab   :  { %810 = vperm.xlu1 %2073, %v2584_v58   ;;  %843 = vperm.xlu0 %2074, %v2586_v59   ;;  %v2591_v2 = vadd.f32 %v692_v61, %v626_v62 }
 0x1af   :  { %819 = vperm.xlu1 %2073, %v2591_v2  }
 0x20a   :  { %v823_v4 = vpop.permute.xlu1 %822 }
 0x20b   :  { %v882_v26 = vrot.slane %v823_v4, %v2599_v57 }
 0x20e   :  { %v826_v19 = vpop.permute.xlu0 %825 }
 0x20f   :  { %v886_v21 = vrot.slane %v826_v19, %v2599_v57 }
 0x211   :  { %v925_v34 = vsel %vm911_vm1, %v886_v21, %v882_v26 }
 0x212   :  { %v802_v5 = vpop.permute.xlu1 %801  ;;  %v799_v6 = vpop.permute.xlu0 %798 }
 0x213   :  { %v854_v3 = vrot.slane %v802_v5, %v2599_v57  ;;  %v850_v18 = vrot.slane %v799_v6, %v2599_v57 }
 0x215   :  { %v912_v43 = vsel %vm911_vm1, %v854_v3, %v850_v18 }
 0x216   :  { %v817_v8 = vpop.permute.xlu1 %816  ;;  %v829_v1 = vpop.permute.xlu0 %828 }
 0x217   :  { %v890_v14 = vrot.slane %v829_v1, %v2599_v57  ;;  %v874_v19 = vrot.slane %v817_v8, %v2599_v57 }
 0x219   :  { %v926_v37 = vsel %vm913_vm2, %v890_v14, %v925_v34 }
 0x21a   :  { %v832_v10 = vpop.permute.xlu0 %831  ;;  %v808_v12 = vpop.permute.xlu1 %807 }
 0x21b   :  { %v894_v28 = vrot.slane %v832_v10, %v2599_v57  ;;  %v862_v52 = vrot.slane %v808_v12, %v2599_v57 }
 0x21d   :  { %v927_v41 = vsel %vm915_vm3, %v894_v28, %v926_v37 }
 0x21e   :  { %v838_v22 = vpop.permute.xlu0 %837  ;;  %v805_v24 = vpop.permute.xlu1 %804 }
 0x21f   :  { %v858_v35 = vrot.slane %v805_v24, %v2599_v57  ;;  %v902_v49 = vrot.slane %v838_v22, %v2599_v57 }
 0x221   :  { %v914_v48 = vsel %vm913_vm2, %v858_v35, %v912_v43 }
 0x222   :  { %v835_v25 = vpop.permute.xlu0 %834  ;;  %v916_v62 = vsel %vm915_vm3, %v862_v52, %v914_v48 }
 0x223   :  { %v898_v32 = vrot.slane %v835_v25, %v2599_v57 }
 0x225   :  { %v928_v44 = vsel %vm917_vm4, %v898_v32, %v927_v41 }
 0x226   :  { %v814_v38 = vpop.permute.xlu1 %813  ;;  %v841_v39 = vpop.permute.xlu0 %840  ;;  %v929_v56 = vsel %vm919_vm5, %v902_v49, %v928_v44 }
 0x227   :  { %v906_v45 = vrot.slane %v841_v39, %v2599_v57  ;;  %v870_v61 = vrot.slane %v814_v38, %v2599_v57 }
 0x229   :  { %v930_v4 = vsel %vm921_vm6, %v906_v45, %v929_v56 }
 0x22a   :  { %v811_v53 = vpop.permute.xlu1 %810  ;;  %v844_v29 = vpop.permute.xlu0 %843 }
 0x22b   :  { %v866_v0 = vrot.slane %v811_v53, %v2599_v57  ;;  %v910_v63 = vrot.slane %v844_v29, %v2599_v57 }
 0x22d   :  { %v918_v5 = vsel %vm917_vm4, %v866_v0, %v916_v62  ;;  %v931_v6 = vsel %vm923_vm7, %v910_v63, %v930_v4 }
 0x22e   :  { %v820_v1 = vpop.permute.xlu1 %819  ;;  %v938_v10 = vsel %vm934_vm8, %v931_v6, -inf  ;;  %v920_v12 = vsel %vm919_vm5, %v870_v61, %v918_v5 }
 0x22f   :  { %v878_v22 = vrot.slane %v820_v1, %v2599_v57  ;;  %939 = vmax.xlane.f32.xlu0 %v938_v10  ;;  %v922_v21 = vsel %vm921_vm6, %v874_v19, %v920_v12 }
 0x231   :  { %v924_v14 = vsel %vm923_vm7, %v878_v22, %v922_v21 }
 0x232   :  { %v935_v24 = vsel %vm934_vm8, %v924_v14, -inf }
 0x233   :  { %936 = vmax.xlane.f32.xlu1 %v935_v24 }
 0x2bc   :  { %v940_v8 = vpop.xlane.xlu0 %939 }
 0x2bd   :  { %v978_v25 = vrot.slane %v940_v8, %v2294_v17  ;;  %v982_v26 = vrot.slane %v940_v8, %v2290_v16  ;;  %v986_v28 = vrot.slane %v940_v8, %v2327_v27  ;;  %v990_v3 = vrot.slane %v940_v8, %v2346_v33 }
 0x2be   :  { %v994_v41 = vrot.slane %v940_v8, %v2369_v40  ;;  %v1006_v6 = vrot.slane %v940_v8, %v2516_v50 }
 0x2bf   :  { %v1031_v18 = vsub.f32 %v2530_v7, %v978_v25  ;;  %v1032_v32 = vsub.f32 %v2535_v15, %v982_v26  ;;  %v1033_v34 = vsub.f32 %v2547_v30, %v986_v28  ;;  %v1034_v43 = vsub.f32 %v2555_v36, %v990_v3 }
 0x2c0   :  { %v2640_v35 = vpop.xlane.xlu1 %936  ;;  %v998_v30 = vrot.slane %v940_v8, %v2392_v47  ;;  %v1035_v45 = vsub.f32 %v2570_v46, %v994_v41  ;;  %v1038_v14 = vsub.f32 %v2586_v59, %v1006_v6 }
 0x2c1   :  { %v1055_v37 = vmul.f32 1.442695, %v1031_v18  ;;  %v1057_v38 = vmul.f32 1.442695, %v1032_v32  ;;  %v950_v39 = vrot.slane %v2640_v35, %v2290_v16  ;;  %v1059_v44 = vmul.f32 1.442695, %v1033_v34 }
 0x2c2   :  { %v954_v7 = vrot.slane %v2640_v35, %v2327_v27  ;;  %v1061_v48 = vmul.f32 1.442695, %v1034_v43  ;;  %v958_v49 = vrot.slane %v2640_v35, %v2346_v33  ;;  %v1036_v53 = vsub.f32 %v2563_v60, %v998_v30 }
 0x2c3   :  { %2107 = vpow2.f32 %v1055_v37  ;;  %v1024_v15 = vsub.f32 %v2541_v23, %v950_v39  ;;  %v1063_v29 = vmul.f32 1.442695, %v1035_v45  ;;  %v946_v0 = vrot.slane %v2640_v35, %v2294_v17 }
 0x2c4   :  { %2109 = vpow2.f32 %v1057_v38  ;;  %v1025_v52 = vsub.f32 %v2565_v42, %v954_v7  ;;  %v962_v23 = vrot.slane %v2640_v35, %v2369_v40  ;;  %v1026_v46 = vsub.f32 %v2557_v9, %v958_v49 }
 0x2c5   :  { %2111 = vpow2.f32 %v1059_v44  ;;  %v1041_v36 = vmul.f32 1.442695, %v1024_v15  ;;  %v1002_v60 = vrot.slane %v940_v8, %v2405_v51  ;;  %v1065_v42 = vmul.f32 1.442695, %v1036_v53 }
 0x2c6   :  { %2113 = vpow2.f32 %v1061_v48  ;;  %v1043_v63 = vmul.f32 1.442695, %v1025_v52  ;;  %v1023_v62 = vsub.f32 %v2539_v20, %v946_v0  ;;  %v966_v4 = vrot.slane %v2640_v35, %v2392_v47 }
 0x2c7   :  { %2115 = vpow2.f32 %v1041_v36  ;;  %v1027_v9 = vsub.f32 %v2584_v58, %v962_v23  ;;  %v1045_v19 = vmul.f32 1.442695, %v1026_v46  ;;  %v1037_v1 = vsub.f32 %v2577_v55, %v1002_v60 }
 0x2c8   :  { %2117 = vpow2.f32 %v1063_v29  ;;  %v1039_v10 = vmul.f32 1.442695, %v1023_v62  ;;  %v970_v20 = vrot.slane %v2640_v35, %v2405_v51  ;;  %v1028_v12 = vsub.f32 %v2575_v54, %v966_v4 }
 0x2c9   :  { %2119 = vpow2.f32 %v1043_v63  ;;  %v1047_v22 = vmul.f32 1.442695, %v1027_v9  ;;  %v1067_v24 = vmul.f32 1.442695, %v1037_v1  ;;  %v974_v55 = vrot.slane %v2640_v35, %v2516_v50 }
 0x2ca   :  { %2121 = vpow2.f32 %v1065_v42  ;;  %v1029_v8 = vsub.f32 %v2549_v31, %v970_v20  ;;  %v1049_v54 = vmul.f32 1.442695, %v1028_v12  ;;  %v1069_v28 = vmul.f32 1.442695, %v1038_v14 }
 0x2cb   :  { %2123 = vpow2.f32 %v1045_v19  ;;  %v1030_v59 = vsub.f32 %v2591_v2, %v974_v55 }
 0x2cc   :  { %2125 = vpow2.f32 %v1039_v10  ;;  %v1051_v3 = vmul.f32 1.442695, %v1029_v8 }
 0x2cd   :  { %v2660_v56 = vpop.eup %2107  ;;  %2127 = vpow2.f32 %v1047_v22  ;;  %v1053_v31 = vmul.f32 1.442695, %v1030_v59 }
 0x2ce   :  { %v2662_v61 = vpop.eup %2109  ;;  %1112 = vperm.xlu1 %2073, %v2660_v56   ;;  %2129 = vpow2.f32 %v1067_v24 }
 0x2cf   :  { %1115 = vperm.xlu0 %2074, %v2662_v61   ;;  %v2671_v5 = vpop.eup %2111  ;;  %2131 = vpow2.f32 %v1049_v54 }
 0x2d0   :  { %v2679_v58 = vpop.eup %2113  ;;  %2133 = vpow2.f32 %v1069_v28 }
 0x2d1   :  { %v2681_v21 = vpop.eup %2115  ;;  %2135 = vpow2.f32 %v1051_v3 }
 0x2d2   :  { %1091 = vperm.xlu1 %2073, %v2681_v21   ;;  %v2689_v25 = vpop.eup %2117  ;;  %2137 = vpow2.f32 %v1053_v31 }
 0x2d3   :  { %1118 = vperm.xlu0 %2074, %v2671_v5   ;;  %v2691_v26 = vpop.eup %2119 }
 0x2d4   :  { %v2696_v18 = vpop.eup %2121 }
 0x2d5   :  { %v2698_v32 = vpop.eup %2123 }
 0x2d6   :  { %1094 = vperm.xlu1 %2073, %v2691_v26   ;;  %v2702_v34 = vpop.eup %2125 }
 0x2d7   :  { %1121 = vperm.xlu0 %2074, %v2679_v58   ;;  %v2704_v35 = vpop.eup %2127 }
 0x2d8   :  { %v2708_v2 = vpop.eup %2129 }
 0x2d9   :  { %v2710_v37 = vpop.eup %2131 }
 0x2da   :  { %1097 = vperm.xlu1 %2073, %v2698_v32   ;;  %v2714_v38 = vpop.eup %2133 }
 0x2db   :  { %1124 = vperm.xlu0 %2074, %v2689_v25   ;;  %v2716_v39 = vpop.eup %2135 }
 0x2dc   :  { %v2720_v41 = vpop.eup %2137 }
 0x2de   :  { %1100 = vperm.xlu1 %2073, %v2704_v35  }
 0x2df   :  { %1127 = vperm.xlu0 %2074, %v2696_v18  }
 0x2e2   :  { %1103 = vperm.xlu1 %2073, %v2710_v37  }
 0x2e3   :  { %1088 = vperm.xlu0 %2074, %v2702_v34  }
 0x2e6   :  { %1106 = vperm.xlu1 %2073, %v2716_v39  }
 0x2e7   :  { %1130 = vperm.xlu0 %2074, %v2708_v2  }
 0x2ea   :  { %1109 = vperm.xlu1 %2073, %v2720_v41  }
 0x2eb   :  { %1133 = vperm.xlu0 %2074, %v2714_v38  }
 0x34d   :  { %v1113_v44 = vpop.permute.xlu1 %1112 }
 0x34e   :  { %v1116_v43 = vpop.permute.xlu0 %1115  ;;  %v1170_v0 = vrot.slane %v1113_v44, %v2599_v57 }
 0x34f   :  { %v1174_v29 = vrot.slane %v1116_v43, %v2599_v57 }
 0x351   :  { %v1092_v15 = vpop.permute.xlu1 %1091  ;;  %v1206_v10 = vsel %vm911_vm1, %v1174_v29, %v1170_v0 }
 0x352   :  { %v1119_v7 = vpop.permute.xlu0 %1118  ;;  %v1142_v23 = vrot.slane %v1092_v15, %v2599_v57 }
 0x353   :  { %v1178_v63 = vrot.slane %v1119_v7, %v2599_v57 }
 0x355   :  { %v1095_v45 = vpop.permute.xlu1 %1094  ;;  %v1207_v22 = vsel %vm913_vm2, %v1178_v63, %v1206_v10 }
 0x356   :  { %v1122_v30 = vpop.permute.xlu0 %1121  ;;  %v1146_v60 = vrot.slane %v1095_v45, %v2599_v57 }
 0x357   :  { %v1182_v42 = vrot.slane %v1122_v30, %v2599_v57 }
 0x359   :  { %v1098_v49 = vpop.permute.xlu1 %1097  ;;  %v1208_v55 = vsel %vm915_vm3, %v1182_v42, %v1207_v22 }
 0x35a   :  { %v1125_v48 = vpop.permute.xlu0 %1124  ;;  %v1150_v62 = vrot.slane %v1098_v49, %v2599_v57 }
 0x35b   :  { %v1186_v9 = vrot.slane %v1125_v48, %v2599_v57 }
 0x35d   :  { %v1101_v36 = vpop.permute.xlu1 %1100  ;;  %v1209_v8 = vsel %vm917_vm4, %v1186_v9, %v1208_v55 }
 0x35e   :  { %v1128_v52 = vpop.permute.xlu0 %1127  ;;  %v1154_v14 = vrot.slane %v1101_v36, %v2599_v57 }
 0x35f   :  { %v1190_v20 = vrot.slane %v1128_v52, %v2599_v57 }
 0x361   :  { %v1104_v6 = vpop.permute.xlu1 %1103  ;;  %v1210_v3 = vsel %vm919_vm5, %v1190_v20, %v1209_v8 }
 0x362   :  { %v1089_v53 = vpop.permute.xlu0 %1088  ;;  %v1158_v31 = vrot.slane %v1104_v6, %v2599_v57 }
 0x363   :  { %v1138_v46 = vrot.slane %v1089_v53, %v2599_v57 }
 0x365   :  { %v1199_v4 = vsel %vm911_vm1, %v1142_v23, %v1138_v46  ;;  %v1107_v28 = vpop.permute.xlu1 %1106 }
 0x366   :  { %v1200_v19 = vsel %vm913_vm2, %v1146_v60, %v1199_v4  ;;  %v1131_v1 = vpop.permute.xlu0 %1130  ;;  %v1162_v44 = vrot.slane %v1107_v28, %v2599_v57 }
 0x367   :  { %v1201_v12 = vsel %vm915_vm3, %v1150_v62, %v1200_v19  ;;  %v1194_v24 = vrot.slane %v1131_v1, %v2599_v57 }
 0x368   :  { %v1202_v54 = vsel %vm917_vm4, %v1154_v14, %v1201_v12 }
 0x369   :  { %v1211_v7 = vsel %vm921_vm6, %v1194_v24, %v1210_v3  ;;  %v1203_v15 = vsel %vm919_vm5, %v1158_v31, %v1202_v54  ;;  %v1110_v45 = vpop.permute.xlu1 %1109 }
 0x36a   :  { %v1134_v59 = vpop.permute.xlu0 %1133  ;;  %v1166_v49 = vrot.slane %v1110_v45, %v2599_v57  ;;  %v1204_v52 = vsel %vm921_vm6, %v1162_v44, %v1203_v15 }
 0x36b   :  { %v1198_v43 = vrot.slane %v1134_v59, %v2599_v57 }
 0x36c   :  { %v1205_v36 = vsel %vm923_vm7, %v1166_v49, %v1204_v52 }
 0x36d   :  { %v1212_v30 = vsel %vm923_vm7, %v1198_v43, %v1211_v7  ;;  %v1215_v53 = vsel %vm934_vm8, %v1205_v36, 0.0 }
 0x36e   :  { %v1218_v48 = vsel %vm934_vm8, %v1212_v30, 0.0  ;;  %1216 = vadd.xlane.f32.xlu1 %v1215_v53 }
 0x36f   :  { %1219 = vadd.xlane.f32.xlu0 %v1218_v48 }
 0x3fb   :  { %v1217_v0 = vpop.xlane.xlu1 %1216 }
 0x3fc   :  { %v1220_v29 = vpop.xlane.xlu0 %1219 }
 0x3fd   :  { %2139 = vrcp.f32 %v1220_v29 }
 0x3fe   :  { %2141 = vrcp.f32 %v1217_v0 }
 0x407   :  { %v2755_v23 = vpop.eup %2139 }
 0x408   :  { %v1264_v46 = vrot.slane %v2755_v23, %v2290_v16  ;;  %v1260_v63 = vrot.slane %v2755_v23, %v2294_v17  ;;  %v1268_v60 = vrot.slane %v2755_v23, %v2327_v27  ;;  %v1272_v42 = vrot.slane %v2755_v23, %v2346_v33  ;;  %v2142_v19 = vpop.eup %2141 }
 0x409   :  { %v1232_v10 = vrot.slane %v2142_v19, %v2290_v16  ;;  %v1236_v22 = vrot.slane %v2142_v19, %v2327_v27  ;;  %v1276_v14 = vrot.slane %v2755_v23, %v2369_v40  ;;  %v1280_v59 = vrot.slane %v2755_v23, %v2392_v47 }
 0x40a   :  { %v1314_v62 = vmul.f32 %v2662_v61, %v1264_v46  ;;  %v1313_v4 = vmul.f32 %v2660_v56, %v1260_v63  ;;  %v1315_v9 = vmul.f32 %v2671_v5, %v1268_v60  ;;  %v1316_v12 = vmul.f32 %v2679_v58, %v1272_v42 }
 0x40b   :  { %v1306_v56 = vmul.f32 %v2681_v21, %v1232_v10  ;;  %v1240_v5 = vrot.slane %v2142_v19, %v2346_v33  ;;  %v1307_v55 = vmul.f32 %v2691_v26, %v1236_v22  ;;  %v1317_v28 = vmul.f32 %v2689_v25, %v1276_v14 }
 0x40c   :  { %v1330_v6 = vmax.f32 %v1314_v62, 1e-05  ;;  %v1329_v1 = vmax.f32 %v1313_v4, 1e-05  ;;  %v1331_v20 = vmax.f32 %v1315_v9, 1e-05  ;;  %v1244_v26 = vrot.slane %v2142_v19, %v2369_v40 }
 0x40d   :  { %v1322_v58 = vmax.f32 %v1306_v56, 1e-05  ;;  %v1332_v54 = vmax.f32 %v1316_v12, 1e-05  ;;  %v1323_v21 = vmax.f32 %v1307_v55, 1e-05  ;;  %v1308_v31 = vmul.f32 %v2698_v32, %v1240_v5 }
 0x40e   :  { %v2773_v24 = vmin.f32 %v1330_v6, 0.99999  ;;  %v2775_v61 = vmin.f32 %v1329_v1, 0.99999  ;;  %v2782_v8 = vmin.f32 %v1331_v20, 0.99999  ;;  %v1318_v7 = vmul.f32 %v2696_v18, %v1280_v59 }
 0x40f   :  { %v2787_v3 = vmin.f32 %v1322_v58, 0.99999  ;;  %v2793_v43 = vmin.f32 %v1332_v54, 0.99999  ;;  %v1333_v44 = vmax.f32 %v1317_v28, 1e-05  ;;  %v1248_v25 = vrot.slane %v2142_v19, %v2392_v47 }
 0x410   :  { %1397 = vperm.xlu0 %2074, %v2773_v24   ;;  %1394 = vperm.xlu1 %2073, %v2775_v61   ;;  %v2797_v15 = vmin.f32 %v1323_v21, 0.99999  ;;  %v1324_v30 = vmax.f32 %v1308_v31, 1e-05  ;;  %v1309_v45 = vmul.f32 %v2704_v35, %v1244_v26  ;;  %v1228_v32 = vrot.slane %v2142_v19, %v2294_v17 }
 0x411   :  { %v2803_v48 = vmin.f32 %v1333_v44, 0.99999  ;;  %v1334_v49 = vmax.f32 %v1318_v7, 1e-05  ;;  %v1252_v52 = vrot.slane %v2142_v19, %v2405_v51  ;;  %v1284_v18 = vrot.slane %v2755_v23, %v2405_v51 }
 0x412   :  { %v2808_v36 = vmin.f32 %v1324_v30, 0.99999  ;;  %v1325_v53 = vmax.f32 %v1309_v45, 1e-05  ;;  %v1310_v29 = vmul.f32 %v2710_v37, %v1248_v25  ;;  %v1305_v35 = vmul.f32 %v2702_v34, %v1228_v32 }
 0x413   :  { %v2814_v0 = vmin.f32 %v1334_v49, 0.99999  ;;  %v1311_v46 = vmul.f32 %v2716_v39, %v1252_v52  ;;  %v1319_v63 = vmul.f32 %v2708_v2, %v1284_v18  ;;  %v1288_v60 = vrot.slane %v2755_v23, %v2516_v50 }
 0x414   :  { %1400 = vperm.xlu0 %2074, %v2782_v8   ;;  %1373 = vperm.xlu1 %2073, %v2787_v3   ;;  %v2820_v42 = vmin.f32 %v1325_v53, 0.99999  ;;  %v1326_v62 = vmax.f32 %v1310_v29, 1e-05  ;;  %v1321_v4 = vmax.f32 %v1305_v35, 1e-05  ;;  %v1256_v37 = vrot.slane %v2142_v19, %v2516_v50 }
 0x415   :  { %v1335_v34 = vmax.f32 %v1319_v63, 1e-05  ;;  %v1320_v9 = vmul.f32 %v2714_v38, %v1288_v60  ;;  %v1327_v2 = vmax.f32 %v1311_v46, 1e-05 }
 0x416   :  { %v2826_v6 = vmin.f32 %v1326_v62, 0.99999  ;;  %v2828_v39 = vmin.f32 %v1321_v4, 0.99999  ;;  %v1312_v23 = vmul.f32 %v2720_v41, %v1256_v37 }
 0x417   :  { %v1336_v1 = vmax.f32 %v1320_v9, 1e-05  ;;  %v2833_v19 = vmin.f32 %v1327_v2, 0.99999  ;;  %v2835_v10 = vmin.f32 %v1335_v34, 0.99999 }
 0x418   :  { %1403 = vperm.xlu0 %2074, %v2793_v43   ;;  %1376 = vperm.xlu1 %2073, %v2797_v15   ;;  %v1328_v20 = vmax.f32 %v1312_v23, 1e-05 }
 0x419   :  { %v2841_v12 = vmin.f32 %v1336_v1, 0.99999 }
 0x41a   :  { %v2839_v38 = vmin.f32 %v1328_v20, 0.99999 }
 0x41c   :  { %1406 = vperm.xlu0 %2074, %v2803_v48   ;;  %1379 = vperm.xlu1 %2073, %v2808_v36  }
 0x420   :  { %1409 = vperm.xlu0 %2074, %v2814_v0   ;;  %1382 = vperm.xlu1 %2073, %v2820_v42  }
 0x424   :  { %1385 = vperm.xlu1 %2073, %v2826_v6   ;;  %1370 = vperm.xlu0 %2074, %v2828_v39  }
 0x428   :  { %1388 = vperm.xlu1 %2073, %v2833_v19   ;;  %1412 = vperm.xlu0 %2074, %v2835_v10  }
 0x42c   :  { %1391 = vperm.xlu1 %2073, %v2839_v38   ;;  %1415 = vperm.xlu0 %2074, %v2841_v12  }
 0x48f   :  { %v1398_v41 = vpop.permute.xlu0 %1397  ;;  %v1395_v22 = vpop.permute.xlu1 %1394 }
 0x490   :  { %v1456_v26 = vrot.slane %v1398_v41, %v2599_v57  ;;  %v1452_v44 = vrot.slane %v1395_v22, %v2599_v57 }
 0x492   :  { %v1488_v63 = vsel %vm911_vm1, %v1456_v26, %v1452_v44 }
 0x493   :  { %v1401_v14 = vpop.permute.xlu0 %1400  ;;  %v1374_v56 = vpop.permute.xlu1 %1373 }
 0x494   :  { %v1424_v7 = vrot.slane %v1374_v56, %v2599_v57  ;;  %v1460_v30 = vrot.slane %v1401_v14, %v2599_v57 }
 0x496   :  { %v1489_v37 = vsel %vm913_vm2, %v1460_v30, %v1488_v63 }
 0x497   :  { %v1404_v5 = vpop.permute.xlu0 %1403  ;;  %v1377_v55 = vpop.permute.xlu1 %1376 }
 0x498   :  { %v1428_v45 = vrot.slane %v1377_v55, %v2599_v57  ;;  %v1464_v32 = vrot.slane %v1404_v5, %v2599_v57 }
 0x49a   :  { %v1490_v23 = vsel %vm915_vm3, %v1464_v32, %v1489_v37 }
 0x49b   :  { %v1407_v58 = vpop.permute.xlu0 %1406  ;;  %v1380_v54 = vpop.permute.xlu1 %1379 }
 0x49c   :  { %v1432_v49 = vrot.slane %v1380_v54, %v2599_v57  ;;  %v1468_v18 = vrot.slane %v1407_v58, %v2599_v57 }
 0x49e   :  { %v1491_v20 = vsel %vm917_vm4, %v1468_v18, %v1490_v23 }
 0x49f   :  { %v1410_v28 = vpop.permute.xlu0 %1409  ;;  %v1383_v59 = vpop.permute.xlu1 %1382 }
 0x4a0   :  { %v1436_v53 = vrot.slane %v1383_v59, %v2599_v57  ;;  %v1472_v60 = vrot.slane %v1410_v28, %v2599_v57 }
 0x4a2   :  { %v1492_v14 = vsel %vm919_vm5, %v1472_v60, %v1491_v20 }
 0x4a3   :  { %v1371_v21 = vpop.permute.xlu0 %1370  ;;  %v1386_v31 = vpop.permute.xlu1 %1385 }
 0x4a4   :  { %v1420_v25 = vrot.slane %v1371_v21, %v2599_v57  ;;  %v1440_v4 = vrot.slane %v1386_v31, %v2599_v57 }
 0x4a6   :  { %v1481_v52 = vsel %vm911_vm1, %v1424_v7, %v1420_v25 }
 0x4a7   :  { %v1482_v29 = vsel %vm913_vm2, %v1428_v45, %v1481_v52  ;;  %v1413_v35 = vpop.permute.xlu0 %1412  ;;  %v1389_v46 = vpop.permute.xlu1 %1388 }
 0x4a8   :  { %v1483_v62 = vsel %vm915_vm3, %v1432_v49, %v1482_v29  ;;  %v1476_v9 = vrot.slane %v1413_v35, %v2599_v57  ;;  %v1444_v2 = vrot.slane %v1389_v46, %v2599_v57 }
 0x4a9   :  { %v1484_v34 = vsel %vm917_vm4, %v1436_v53, %v1483_v62 }
 0x4aa   :  { %v1485_v1 = vsel %vm919_vm5, %v1440_v4, %v1484_v34  ;;  %v1493_v55 = vsel %vm921_vm6, %v1476_v9, %v1492_v14 }
 0x4ab   :  { %v1416_v41 = vpop.permute.xlu0 %1415  ;;  %v1392_v22 = vpop.permute.xlu1 %1391  ;;  %v1486_v58 = vsel %vm921_vm6, %v1444_v2, %v1485_v1 }
 0x4ac   :  { %v1480_v56 = vrot.slane %v1416_v41, %v2599_v57  ;;  %v1448_v5 = vrot.slane %v1392_v22, %v2599_v57 }
 0x4ae   :  { %v1494_v54 = vsel %vm923_vm7, %v1480_v56, %v1493_v55  ;;  %v1487_v28 = vsel %vm923_vm7, %v1448_v5, %v1486_v58 }
 0x4af   :  { %v1500_v59 = vsel %vm934_vm8, %v1494_v54, 0.0  ;;  %v1497_v21 = vsel %vm934_vm8, %v1487_v28, 0.0 }
 0x4b0   :  { %1501 = vadd.xlane.f32.xlu0 %v1500_v59  ;;  %1498 = vadd.xlane.f32.xlu1 %v1497_v21  ;;  %v2177_v21 = vld [vmem:[%s3104_s1 + $0x50] sm:$0xff] }
 0x53d   :  { %v1502_v31 = vpop.xlane.xlu0 %1501  ;;  %v1499_v26 = vpop.xlane.xlu1 %1498 }
 0x53e   :  { %v1544_v44 = vrot.slane %v1502_v31, %v2290_v16  ;;  %v1540_v57 = vrot.slane %v1502_v31, %v2294_v17  ;;  %v1548_v7 = vrot.slane %v1502_v31, %v2327_v27  ;;  %v1512_v25 = vrot.slane %v1499_v26, %v2290_v16 }
 0x53f   :  { %v1552_v30 = vrot.slane %v1502_v31, %v2346_v33  ;;  %v1516_v45 = vrot.slane %v1499_v26, %v2327_v27  ;;  %v1556_v32 = vrot.slane %v1502_v31, %v2369_v40  ;;  %v1520_v49 = vrot.slane %v1499_v26, %v2346_v33 }
 0x540   :  { %2143 = vrcp.f32 %v1544_v44  ;;  %v1560_v18 = vrot.slane %v1502_v31, %v2392_v47  ;;  %v1524_v29 = vrot.slane %v1499_v26, %v2369_v40  ;;  %v1508_v63 = vrot.slane %v1499_v26, %v2294_v17 }
 0x541   :  { %2145 = vrcp.f32 %v1540_v57  ;;  %v1528_v60 = vrot.slane %v1499_v26, %v2392_v47  ;;  %v1564_v40 = vrot.slane %v1502_v31, %v2405_v51  ;;  %v1532_v37 = vrot.slane %v1499_v26, %v2405_v51  ;;  %v2178_v57 = vld [vmem:[%s3104_s1 + $0x8] sm:$0xff] }
 0x542   :  { %2147 = vrcp.f32 %v1548_v7  ;;  %v1568_v47 = vrot.slane %v1502_v31, %v2516_v50  ;;  %v1536_v9 = vrot.slane %v1499_v26, %v2516_v50 }
 0x543   :  { %2149 = vrcp.f32 %v1512_v25 }
 0x544   :  { %2151 = vrcp.f32 %v1552_v30 }
 0x545   :  { %2153 = vrcp.f32 %v1516_v45 }
 0x546   :  { %2155 = vrcp.f32 %v1556_v32 }
 0x547   :  { %2157 = vrcp.f32 %v1520_v49 }
 0x548   :  { %2159 = vrcp.f32 %v1560_v18  ;;  %v2179_v18 = vld [vmem:[%s3104_s1 + $0x58] sm:$0xff] }
 0x549   :  { %2161 = vrcp.f32 %v1524_v29 }
 0x54a   :  { %v2144_v52 = vpop.eup %2143  ;;  %2163 = vrcp.f32 %v1508_v63 }
 0x54b   :  { %v2146_v53 = vpop.eup %2145  ;;  %v1604_v16 = vmul.f32 %v2144_v52, %v2773_v24  ;;  %2165 = vrcp.f32 %v1528_v60  ;;  %v1857_v52 = vadd.s32 4294967264, %v2595_v11 }
 0x54c   :  { %v2148_v35 = vpop.eup %2147  ;;  %v1602_v46 = vmul.f32 %v2146_v53, %v2775_v61  ;;  %2167 = vrcp.f32 %v1564_v40  ;;  %v2181_v40 = vld [vmem:[%s3104_s1 + $0x60] sm:$0xff] }
 0x54d   :  { %v2150_v27 = vpop.eup %2149  ;;  %1664 = vperm.xlu0 %2074, %v1604_v16   ;;  %v1606_v33 = vmul.f32 %v2148_v35, %v2782_v8  ;;  %2169 = vrcp.f32 %v1532_v37  ;;  %v2180_v35 = vld [vmem:[%s3104_s1 + $0x10] sm:$0xff] }
 0x54e   :  { %1659 = vperm.xlu1 %2073, %v1602_v46   ;;  %v2152_v62 = vpop.eup %2151  ;;  %v1588_v24 = vmul.f32 %v2150_v27, %v2787_v3  ;;  %2171 = vrcp.f32 %v1568_v47 }
 0x54f   :  { %v2154_v4 = vpop.eup %2153  ;;  %v1608_v61 = vmul.f32 %v2152_v62, %v2793_v43  ;;  %2173 = vrcp.f32 %v1536_v9 }
 0x550   :  { %v2156_v17 = vpop.eup %2155  ;;  %v1590_v8 = vmul.f32 %v2154_v4, %v2797_v15  ;;  %v2953_v4 = vsub.s32 %v1857_v52, %v2283_v13 }
 0x551   :  { %1669 = vperm.xlu0 %2074, %v1606_v33   ;;  %v2158_v34 = vpop.eup %2157  ;;  %v1610_v3 = vmul.f32 %v2156_v17, %v2803_v48 }
 0x552   :  { %1624 = vperm.xlu1 %2073, %v1588_v24   ;;  %v2160_v2 = vpop.eup %2159  ;;  %v1592_v43 = vmul.f32 %v2158_v34, %v2808_v36 }
 0x553   :  { %v2162_v23 = vpop.eup %2161  ;;  %v1612_v51 = vmul.f32 %v2160_v2, %v2814_v0 }
 0x554   :  { %v2164_v15 = vpop.eup %2163  ;;  %v1594_v1 = vmul.f32 %v2162_v23, %v2820_v42 }
 0x555   :  { %1674 = vperm.xlu0 %2074, %v1608_v61   ;;  %v2166_v20 = vpop.eup %2165  ;;  %v1586_v48 = vmul.f32 %v2164_v15, %v2828_v39 }
 0x556   :  { %1629 = vperm.xlu1 %2073, %v1590_v8   ;;  %v2168_v41 = vpop.eup %2167  ;;  %v1596_v50 = vmul.f32 %v2166_v20, %v2826_v6  ;;  %v2175_v6 = vld [vmem:[%s3104_s1 + $0x48] sm:$0xff] }
 0x557   :  { %v2170_v22 = vpop.eup %2169  ;;  %v1614_v36 = vmul.f32 %v2168_v41, %v2835_v10 }
 0x558   :  { %v2172_v14 = vpop.eup %2171  ;;  %v1598_v0 = vmul.f32 %v2170_v22, %v2833_v19  ;;  %v2176_v19 = vld [vmem:[%s3104_s1 + $0x40] sm:$0xff] }
 0x559   :  { %1679 = vperm.xlu0 %2074, %v1610_v3   ;;  %v2174_v56 = vpop.eup %2173  ;;  %v1616_v42 = vmul.f32 %v2172_v14, %v2841_v12  ;;  %v2183_v14 = vld [vmem:[%s3104_s1 + $0x68] sm:$0xff] }
 0x55a   :  { %1634 = vperm.xlu1 %2073, %v1592_v43   ;;  %v1600_v5 = vmul.f32 %v2174_v56, %v2839_v38 }
 0x55d   :  { %1684 = vperm.xlu0 %2074, %v1612_v51   ;;  %v2182_v51 = vld [vmem:[%s3104_s1 + $0x18] sm:$0xff] }
 0x55e   :  { %1639 = vperm.xlu1 %2073, %v1594_v1  }
 0x561   :  { %1619 = vperm.xlu0 %2074, %v1586_v48  }
 0x562   :  { %1644 = vperm.xlu1 %2073, %v1596_v50  }
 0x565   :  { %1689 = vperm.xlu0 %2074, %v1614_v36  }
 0x566   :  { %1649 = vperm.xlu1 %2073, %v1598_v0  }
 0x569   :  { %1694 = vperm.xlu0 %2074, %v1616_v42  }
 0x56a   :  { %1654 = vperm.xlu1 %2073, %v1600_v5  }
 0x5cc   :  { %v2909_v39 = vpop.permute.xlu0 %1664 }
 0x5cd   :  { %v1706_v10 = vmul.f32 %v2175_v6, %v2909_v39  ;;  %v2915_v55 = vpop.permute.xlu1 %1659  ;;  %v1897_v43 = vrot.slane %v2909_v39, %v2953_v4 }
 0x5ce   :  { %v1705_v12 = vmul.f32 %v2176_v19, %v2915_v55  ;;  %v1893_v13 = vrot.slane %v2915_v55, %v2953_v4 }
 0x5cf   :  { %v1776_v38 = vsel %vm59_vm0, %v1706_v10, 0.0 }
 0x5d0   :  { %v1777_v58 = vrot.slane %v1776_v38, 4  ;;  %v1769_v54 = vsel %vm59_vm0, %v1705_v12, 0.0  ;;  %v2923_v28 = vpop.permute.xlu0 %1669  ;;  %v1929_v10 = vsel %vm911_vm1, %v1897_v43, %v1893_v13  ;;  %v2184_v12 = vld [vmem:[%s3104_s1 + $0x20] sm:$0xff]  ;;  %v2187_v43 = vld [vmem:[%s3104_s1 + $0x70] sm:$0xff] }
 0x5d1   :  { %v1770_v59 = vrot.slane %v1769_v54, 4  ;;  %v1707_v31 = vmul.f32 %v2177_v21, %v2923_v28  ;;  %v2929_v26 = vpop.permute.xlu1 %1624  ;;  %v1901_v48 = vrot.slane %v2923_v28, %v2953_v4 }
 0x5d2   :  { %v1778_v44 = vadd.f32 %v1777_v58, %v1776_v38  ;;  %v1698_v7 = vmul.f32 %v2178_v57, %v2929_v26  ;;  %v1865_v55 = vrot.slane %v2929_v26, %v2953_v4  ;;  %v2190_v26 = vld [vmem:[%s3104_s1 + $0x38] sm:$0xff] }
 0x5d3   :  { %v1771_v25 = vadd.f32 %v1770_v59, %v1769_v54  ;;  %v1783_v30 = vsel %vm59_vm0, %v1707_v31, 0.0  ;;  %v1930_v54 = vsel %vm913_vm2, %v1901_v48, %v1929_v10 }
 0x5d4   :  { %v1784_v45 = vrot.slane %v1783_v30, 4  ;;  %v1720_v32 = vsel %vm59_vm0, %v1698_v7, 0.0  ;;  %v2937_v49 = vpop.permute.xlu0 %1674  ;;  %v1779_v29 = vrot.slane %v1778_v44, 2 }
 0x5d5   :  { %v1708_v53 = vmul.f32 %v2179_v18, %v2937_v49  ;;  %v2944_v16 = vpop.permute.xlu1 %1629  ;;  %v1772_v27 = vrot.slane %v1771_v25, 2  ;;  %v1721_v63 = vrot.slane %v1720_v32, 4  ;;  %v1905_v5 = vrot.slane %v2937_v49, %v2953_v4  ;;  %v2185_v18 = vld [vmem:[%s3104_s1] sm:$0xff] }
 0x5d6   :  { %v1699_v46 = vmul.f32 %v2180_v35, %v2944_v16  ;;  %v1785_v11 = vadd.f32 %v1784_v45, %v1783_v30  ;;  %v1780_v17 = vadd.f32 %v1779_v29, %v1778_v44  ;;  %v2186_v29 = vld [vmem:[%s3104_s1 + $0x28] sm:$0xff] }
 0x5d7   :  { %v1790_v33 = vsel %vm59_vm0, %v1708_v53, 0.0  ;;  %v1773_v34 = vadd.f32 %v1772_v27, %v1771_v25  ;;  %v1722_v47 = vadd.f32 %v1721_v63, %v1720_v32  ;;  %v1931_v45 = vsel %vm915_vm3, %v1905_v5, %v1930_v54 }
 0x5d8   :  { %v1791_v60 = vrot.slane %v1790_v33, 4  ;;  %v1727_v62 = vsel %vm59_vm0, %v1699_v46, 0.0  ;;  %v1680_v24 = vpop.permute.xlu0 %1679  ;;  %v1786_v3 = vrot.slane %v1785_v11, 2  ;;  %v1781_v20 = vrot.slane %v1780_v17, 1 }
 0x5d9   :  { %v1709_v61 = vmul.f32 %v2181_v40, %v1680_v24  ;;  %v2958_v37 = vpop.permute.xlu1 %1634  ;;  %v1728_v8 = vrot.slane %v1727_v62, 4  ;;  %v1774_v50 = vrot.slane %v1773_v34, 1  ;;  %v1723_v22 = vrot.slane %v1722_v47, 2 }
 0x5da   :  { %v1792_v9 = vadd.f32 %v1791_v60, %v1790_v33  ;;  %v1700_v15 = vmul.f32 %v2182_v51, %v2958_v37  ;;  %v1787_v56 = vadd.f32 %v1786_v3, %v1785_v11  ;;  %v1782_v58 = vadd.f32 %v1781_v20, %v1780_v17 }
 0x5db   :  { %v1797_v23 = vsel %vm59_vm0, %v1709_v61, 0.0  ;;  %v1729_v41 = vadd.f32 %v1728_v8, %v1727_v62  ;;  %v1909_v59 = vrot.slane %v1680_v24, %v2953_v4  ;;  %v1775_v31 = vadd.f32 %v1774_v50, %v1773_v34 }
 0x5dc   :  { %v2960_v2 = vpop.permute.xlu0 %1684  ;;  %v1734_v36 = vsel %vm59_vm0, %v1700_v15, 0.0  ;;  %v1793_v42 = vrot.slane %v1792_v9, 2  ;;  %v1798_v39 = vrot.slane %v1797_v23, 4  ;;  %v1724_v44 = vadd.f32 %v1723_v22, %v1722_v47 }
 0x5dd   :  { %v2971_v1 = vpop.permute.xlu1 %1639  ;;  %v1710_v0 = vmul.f32 %v2183_v14, %v2960_v2  ;;  %v1735_v19 = vrot.slane %v1734_v36, 4  ;;  %v1730_v28 = vrot.slane %v1729_v41, 2  ;;  %v1788_v25 = vrot.slane %v1787_v56, 1 }
 0x5de   :  { %v1701_v38 = vmul.f32 %v2184_v12, %v2971_v1  ;;  %v1794_v30 = vadd.f32 %v1793_v42, %v1792_v9  ;;  %v1799_v32 = vadd.f32 %v1798_v39, %v1797_v23  ;;  %v1869_v27 = vrot.slane %v2944_v16, %v2953_v4 }
 0x5df   :  { %v1804_v57 = vsel %vm59_vm0, %v1710_v0, 0.0  ;;  %v1736_v49 = vadd.f32 %v1735_v19, %v1734_v36  ;;  %v1731_v46 = vadd.f32 %v1730_v28, %v1729_v41  ;;  %v3009_v63 = vsel %vm917_vm4, %v1909_v59, %v1931_v45 }
 0x5e0   :  { %v2982_v6 = vpop.permute.xlu0 %1619  ;;  %v1741_v7 = vsel %vm59_vm0, %v1701_v38, 0.0  ;;  %v1805_v33 = vrot.slane %v1804_v57, 4  ;;  %v1848_v60 = vsel %vm911_vm1, %v1782_v58, %v1775_v31  ;;  %v1725_v62 = vrot.slane %v1724_v44, 1 }
 0x5e1   :  { %v2993_v21 = vpop.permute.xlu1 %1644  ;;  %v1742_v52 = vrot.slane %v1741_v7, 4  ;;  %v1697_v53 = vmul.f32 %v2185_v18, %v2982_v6  ;;  %v1789_v61 = vadd.f32 %v1788_v25, %v1787_v56  ;;  %v1795_v17 = vrot.slane %v1794_v30, 1 }
 0x5e2   :  { %v1702_v35 = vmul.f32 %v2186_v29, %v2993_v21  ;;  %v1800_v16 = vrot.slane %v1799_v32, 2  ;;  %v1737_v3 = vrot.slane %v1736_v49, 2  ;;  %v1732_v23 = vrot.slane %v1731_v46, 1 }
 0x5e3   :  { %v1713_v24 = vsel %vm59_vm0, %v1697_v53, 0.0  ;;  %v1743_v8 = vadd.f32 %v1742_v52, %v1741_v7  ;;  %v1873_v51 = vrot.slane %v2958_v37, %v2953_v4  ;;  %v1806_v15 = vadd.f32 %v1805_v33, %v1804_v57  ;;  %v2188_v37 = vld [vmem:[%s3104_s1 + $0x30] sm:$0xff] }
 0x5e4   :  { %v3011_v11 = vpop.permute.xlu0 %1689  ;;  %v1748_v40 = vsel %vm59_vm0, %v1702_v35, 0.0  ;;  %v1714_v34 = vrot.slane %v1713_v24, 4  ;;  %v1726_v48 = vadd.f32 %v1725_v62, %v1724_v44  ;;  %v1861_v41 = vrot.slane %v2982_v6, %v2953_v4 }
 0x5e5   :  { %v3016_v47 = vpop.permute.xlu1 %1649  ;;  %v1749_v9 = vrot.slane %v1748_v40, 4  ;;  %v1711_v13 = vmul.f32 %v2187_v43, %v3011_v11  ;;  %v1849_v36 = vsel %vm913_vm2, %v1789_v61, %v1848_v60  ;;  %v1744_v14 = vrot.slane %v1743_v8, 2 }
 0x5e6   :  { %v1715_v20 = vadd.f32 %v1714_v34, %v1713_v24  ;;  %v1796_v42 = vadd.f32 %v1795_v17, %v1794_v30  ;;  %v1801_v5 = vadd.f32 %v1800_v16, %v1799_v32  ;;  %v1738_v39 = vadd.f32 %v1737_v3, %v1736_v49  ;;  %v2189_v49 = vld [vmem:[%s3104_s1 + $0x78] sm:$0xff]  ;;  %s2217_s1 = smov [#allocation3]  }
 0x5e7   :  { %v1750_v50 = vadd.f32 %v1749_v9, %v1748_v40  ;;  %v1811_v22 = vsel %vm59_vm0, %v1711_v13, 0.0  ;;  %v1703_v10 = vmul.f32 %v2188_v37, %v3016_v47  ;;  %v1733_v19 = vadd.f32 %v1732_v23, %v1731_v46  ;;  %s1950_s28 = sshll.u32 %s2217_s1, 4  ;;  %s1951_s28 = int_to_ptr.vmem [resolvable:$true] %s1950_s28 }
 0x5e8   :  { %v1716_v0 = vrot.slane %v1715_v20, 2  ;;  %v1812_v56 = vrot.slane %v1811_v22, 4  ;;  %v1807_v12 = vrot.slane %v1806_v15, 2  ;;  %v3032_v58 = vpop.permute.xlu0 %1694  ;;  %v1877_v28 = vrot.slane %v2971_v1, %v2953_v4  ;;  %s2191_s29 = scalar_lea.vmem %s1951_s28, 256  ;;  %p2196_p1 = scmp.lt.s32.totalorder %s1951_s28, %s1951_s28 }
 0x5e9   :  { %v3034_v54 = vpop.permute.xlu1 %1654  ;;  %v1922_v59 = vsel %vm911_vm1, %v1865_v55, %v1861_v41  ;;  %v1751_v31 = vrot.slane %v1750_v50, 2  ;;  %v1755_v44 = vsel %vm59_vm0, %v1703_v10, 0.0  ;;  %v1745_v57 = vadd.f32 %v1744_v14, %v1743_v8  ;;  %p2192_p0 = scmp.ne.s32.totalorder %s1951_s28, %s2191_s29  ;;  %p2197_p2 = scmp.lt.s32.totalorder %s2191_s29, %s2191_s29 }
 0x5ea   :  { %v1717_v6 = vadd.f32 %v1716_v0, %v1715_v20  ;;  %v1813_v38 = vadd.f32 %v1812_v56, %v1811_v22  ;;  %v1756_v30 = vrot.slane %v1755_v44, 4  ;;  %v1802_v45 = vrot.slane %v1801_v5, 1 }
 0x5eb   :  { %v1739_v32 = vrot.slane %v1738_v39, 1  ;;  %v1712_v1 = vmul.f32 %v2189_v49, %v3032_v58  ;;  %v1704_v55 = vmul.f32 %v2190_v26, %v3034_v54  ;;  %v1808_v52 = vadd.f32 %v1807_v12, %v1806_v15  ;;  %p2198_p3 = por %p2197_p2, %p2196_p1 }
 0x5ec   :  { %v1718_v7 = vrot.slane %v1717_v6, 1  ;;  %v1814_v25 = vrot.slane %v1813_v38, 2  ;;  %v1923_v53 = vsel %vm913_vm2, %v1869_v27, %v1922_v59  ;;  %v1757_v29 = vadd.f32 %v1756_v30, %v1755_v44 }
 0x5ed   :  { %v1752_v35 = vadd.f32 %v1751_v31, %v1750_v50  ;;  %v1818_v33 = vsel %vm59_vm0, %v1712_v1, 0.0  ;;  %v1762_v60 = vsel %vm59_vm0, %v1704_v55, 0.0  ;;  %v1746_v62 = vrot.slane %v1745_v57, 1  ;;  %p2199_p4 = pnand %p2198_p3, %p2192_p0 }
 0x5ee   :  { %v1719_v18 = vadd.f32 %v1718_v7, %v1717_v6  ;;  %v1815_v46 = vadd.f32 %v1814_v25, %v1813_v38  ;;  %v1758_v40 = vrot.slane %v1757_v29, 2  ;;  %v1819_v61 = vrot.slane %v1818_v33, 4 }
 0x5ef   :  { %v1803_v17 = vadd.f32 %v1802_v45, %v1801_v5  ;;  %v1740_v8 = vadd.f32 %v1739_v32, %v1738_v39  ;;  %v1763_v16 = vrot.slane %v1762_v60, 4  ;;  %v1809_v3 = vrot.slane %v1808_v52, 1 }
 0x5f0   :  { %v1841_v24 = vsel %vm911_vm1, %v1726_v48, %v1719_v18  ;;  %v1924_v27 = vsel %vm915_vm3, %v1873_v51, %v1923_v53  ;;  %v1759_v9 = vadd.f32 %v1758_v40, %v1757_v29  ;;  %v1820_v43 = vadd.f32 %v1819_v61, %v1818_v33 }
 0x5f1   :  { %v1842_v34 = vsel %vm913_vm2, %v1733_v19, %v1841_v24  ;;  %v1753_v23 = vrot.slane %v1752_v35, 1  ;;  %v1816_v15 = vrot.slane %v1815_v46, 1  ;;  %v1764_v20 = vadd.f32 %v1763_v16, %v1762_v60 }
 0x5f2   :  { %v1843_v13 = vsel %vm915_vm3, %v1740_v8, %v1842_v34  ;;  %v1850_v41 = vsel %vm915_vm3, %v1796_v42, %v1849_v36  ;;  %v1747_v48 = vadd.f32 %v1746_v62, %v1745_v57  ;;  %v1760_v50 = vrot.slane %v1759_v9, 1 }
 0x5f3   :  { %v1821_v22 = vrot.slane %v1820_v43, 2  ;;  %v1851_v14 = vsel %vm917_vm4, %v1803_v17, %v1850_v41  ;;  %v1913_v0 = vrot.slane %v2960_v2, %v2953_v4  ;;  %v1881_v51 = vrot.slane %v2993_v21, %v2953_v4 }
 0x5f4   :  { %v1765_v56 = vrot.slane %v1764_v20, 2  ;;  %v1810_v5 = vadd.f32 %v1809_v3, %v1808_v52  ;;  %v1844_v39 = vsel %vm917_vm4, %v1747_v48, %v1843_v13  ;;  %v1925_v37 = vsel %vm917_vm4, %v1877_v28, %v1924_v27 }
 0x5f5   :  { %v1822_v10 = vadd.f32 %v1821_v22, %v1820_v43  ;;  %v1754_v19 = vadd.f32 %v1753_v23, %v1752_v35  ;;  %v1817_v36 = vadd.f32 %v1816_v15, %v1815_v46  ;;  %v1917_v42 = vrot.slane %v3011_v11, %v2953_v4 }
 0x5f6   :  { %v1766_v12 = vadd.f32 %v1765_v56, %v1764_v20  ;;  %v1761_v6 = vadd.f32 %v1760_v50, %v1759_v9  ;;  %v1885_v2 = vrot.slane %v3016_v47, %v2953_v4  ;;  %v1921_v21 = vrot.slane %v3032_v58, %v2953_v4 }
 0x5f7   :  { %v1823_v38 = vrot.slane %v1822_v10, 1  ;;  %v1845_v59 = vsel %vm919_vm5, %v1754_v19, %v1844_v39  ;;  %v1926_v31 = vsel %vm919_vm5, %v1881_v51, %v1925_v37  ;;  %v1889_v44 = vrot.slane %v3034_v54, %v2953_v4 }
 0x5f8   :  { %v1767_v28 = vrot.slane %v1766_v12, 1  ;;  %v1852_v57 = vsel %vm919_vm5, %v1810_v5, %v1851_v14  ;;  %v1933_v11 = vsel %vm919_vm5, %v1913_v0, %v3009_v63  ;;  %v1927_v30 = vsel %vm921_vm6, %v1885_v2, %v1926_v31 }
 0x5f9   :  { %v1824_v7 = vadd.f32 %v1823_v38, %v1822_v10  ;;  %v1934_v47 = vsel %vm921_vm6, %v1917_v42, %v1933_v11  ;;  %v1853_v25 = vsel %vm921_vm6, %v1817_v36, %v1852_v57  ;;  %v1846_v54 = vsel %vm921_vm6, %v1761_v6, %v1845_v59 }
 0x5fa   :  { %v1768_v58 = vadd.f32 %v1767_v28, %v1766_v12  ;;  %v1935_v4 = vsel %vm923_vm7, %v1921_v21, %v1934_v47  ;;  %v1928_v49 = vsel %vm923_vm7, %v1889_v44, %v1927_v30 }
 0x5fb   :  { %v1854_v45 = vsel %vm923_vm7, %v1824_v7, %v1853_v25 }
 0x5fc   :  { %v1939_v32 = vsel %vm59_vm0, %v1854_v45, %v1935_v4  ;;  %v1847_v63 = vsel %vm923_vm7, %v1768_v58, %v1846_v54 }
 0x5fd   :  { %v1942_v1 = vsel %vm1940_vm9, %v1939_v32, 0.0  ;;  %v1938_v26 = vsel %vm59_vm0, %v1847_v63, %v1928_v49 }
 0x5fe   :  { %1944 = vst [vmem:[#allocation3 + $0x8] sm:$0xff] %v1942_v1  ;;  %v1941_v55 = vsel %vm1940_vm9, %v1938_v26, 0.0 }
 0x5ff   :  { %1943 = vst [vmem:[#allocation3] sm:$0xff] %v1941_v55 }
 0x600   :  { %2202 = shalt.err (!%p2199_p4)
}
 0x601   :  { %s2203_s8 = scalar_lea.hbm %s3109_s6, 256 }
 0x602   :  { %p2204_p5 = scmp.ne.s32.totalorder %s3109_s6, %s2203_s8  ;;  %p2207_p6 = scmp.lt.u32.totalorder %s2203_s8, %s3109_s6 }
 0x604   :  { %p2209_p7 = pnand %p2207_p6, %p2204_p5 }
 0x606   :  { %2212 = shalt.err (!%p2209_p7)
}
 0x607   :  { %s2218_s13 = smov 128   ;;  %s2219_s14 = smov 8  }
 0x608   :  { %1956 = dma.vmem_to_hbm [thread:$0]  %s1951_s28, 256, %s3109_s6, [#allocation4], %s2218_s13, %s2218_s13, %s2219_s14  }
 0x609   :  { %2213 = dma.done.wait [#allocation4], 256  }
 0x60a   :  { %2214 = vsyncadd [#allocation4], 4294967040 }
 0x60b   :  { %1960 = vsyncpa [#allocation4], 1 }

</bundles_post_ra>
